<compile_context>
chip_gen: v6e
topology: v6e:2x2x1
jax: 0.10.0
libtpu: 0.0.40
codegen_flags: <defaults>
</compile_context>

<pallas_src>
import functools

import numpy as np
import jax
import jax.numpy as jnp
from jax import lax
from jax.experimental import pallas as pl
from jax.experimental.pallas import tpu as pltpu


def _penc_kernel(x_ref, r_ref, f_ref, p_ref, o_ref, *, d_in, n_pass):
    # x_ref: (TN, d_in)      input rows
    # r_ref: (d_in, d_out)   0/1 selector: R[c, k] = 1 iff column k reads x[:, c]
    # f_ref: (1, d_out)      per-column frequency (1.0 on passthrough columns)
    # p_ref: (1, d_out)      per-column phase     (0.0 on passthrough columns)
    # o_ref: (TN, d_out)
    x = x_ref[...]                                       # (TN, d_in)
    r = r_ref[...]                                       # (d_in, d_out)

    # Replicate x across output columns: xrep[:, k] = x[:, k-channel].
    # d_in is tiny (1..3); a short unrolled broadcast-multiply-add keeps this
    # on the VPU, exact, and avoids jnp.tile / cross-lane relayouts.
    xrep = x[:, 0:1] * r[0:1, :]                         # (TN, d_out)
    for c in range(1, d_in):
        xrep = xrep + x[:, c:c + 1] * r[c:c + 1, :]

    emb = jnp.sin(xrep * f_ref[...] + p_ref[...])        # (TN, d_out)

    if n_pass:  # include_input: first n_pass columns pass x through unchanged
        col = lax.broadcasted_iota(jnp.int32, emb.shape, 1)
        emb = jnp.where(col < n_pass, xrep, emb)

    o_ref[...] = emb.astype(o_ref.dtype)                 # single full-width store


class PositionalEncodingNeRFPallas:
    """JAX/Pallas equivalent of PositionalEncoding_NeRF.forward."""

    def __init__(self, num_freqs=6, d_in=3, freq_factor=np.pi,
                 include_input=False, out_dtype=jnp.float32, row_tile=8192):
        self.num_freqs = int(num_freqs)
        self.d_in = int(d_in)
        self.include_input = bool(include_input)
        self.out_dtype = out_dtype
        self.row_tile = int(row_tile)

        base = self.d_in if self.include_input else 0
        self._n_pass = base
        self.d_out = 2 * self.num_freqs * self.d_in + base

        # freqs = freq_factor * 2**arange(F), repeat_interleave(2) -> (2F,)
        freqs = (freq_factor * (2.0 ** np.arange(self.num_freqs))).astype(np.float32)
        freqs_ri = np.repeat(freqs, 2)                       # (2F,)
        phases = np.zeros(2 * self.num_freqs, np.float32)
        phases[1::2] = np.float32(np.pi * 0.5)               # (2F,)

        # Per-output-column constants. Column k = base + j*d_in + c.
        R = np.zeros((self.d_in, self.d_out), np.float32)
        F = np.ones((1, self.d_out), np.float32)
        P = np.zeros((1, self.d_out), np.float32)
        if self.include_input:
            for c in range(self.d_in):
                R[c, c] = 1.0                                # passthrough columns
        for j in range(2 * self.num_freqs):
            for c in range(self.d_in):
                k = base + j * self.d_in + c
                R[c, k] = 1.0
                F[0, k] = freqs_ri[j]
                P[0, k] = phases[j]

        self._R = jnp.asarray(R)
        self._F = jnp.asarray(F)
        self._P = jnp.asarray(P)

    def __call__(self, x, *, row_tile=None):
        row_tile = self.row_tile if row_tile is None else int(row_tile)
        original_shape = x.shape
        assert original_shape[-1] == self.d_in
        x2 = jnp.reshape(x, (-1, self.d_in)).astype(jnp.float32)
        n = x2.shape[0]

        # Round rows up to a multiple of 8 (sublane). Ragged last grid block is
        # handled by Pallas masking, so no output slice copy in the common case.
        n8 = ((n + 7) // 8) * 8
        if n8 != n:
            x2 = jnp.concatenate(
                [x2, jnp.zeros((n8 - n, self.d_in), jnp.float32)], axis=0)

        tn = min(row_tile, n8)
        tn = max(8, (tn // 8) * 8)
        grid = (pl.cdiv(n8, tn),)

        kernel = functools.partial(
            _penc_kernel, d_in=self.d_in, n_pass=self._n_pass)

        out = pl.pallas_call(
            kernel,
            out_shape=jax.ShapeDtypeStruct((n8, self.d_out), self.out_dtype),
            grid=grid,
            in_specs=[
                pl.BlockSpec((tn, self.d_in), lambda i: (i, 0)),
                pl.BlockSpec((self.d_in, self.d_out), lambda i: (0, 0)),
                pl.BlockSpec((1, self.d_out), lambda i: (0, 0)),
                pl.BlockSpec((1, self.d_out), lambda i: (0, 0)),
            ],
            out_specs=pl.BlockSpec((tn, self.d_out), lambda i: (i, 0)),
            compiler_params=pltpu.CompilerParams(
                dimension_semantics=("parallel",)),
        )(x2, self._R, self._F, self._P)

        if n8 != n:
            out = out[:n]
        return out.reshape(*original_shape[:-1], self.d_out)


def _reference(x, num_freqs, d_in, freq_factor, include_input):
    """Pure-JAX reference mirroring the PyTorch forward exactly."""
    original_shape = x.shape
    xf = x.reshape(-1, d_in).astype(jnp.float32)
    freqs = (freq_factor * (2.0 ** np.arange(num_freqs))).astype(np.float32)
    freqs_ri = np.repeat(freqs, 2)                              # (2F,)
    phases = np.zeros(2 * num_freqs, np.float32)
    phases[1::2] = np.float32(np.pi * 0.5)
    emb = jnp.sin(xf[:, None, :] * freqs_ri[None, :, None]
                  + phases[None, :, None])                      # (N, 2F, d_in)
    emb = emb.reshape(xf.shape[0], -1)
    if include_input:
        emb = jnp.concatenate([xf, emb], axis=-1)
    d_out = 2 * num_freqs * d_in + (d_in if include_input else 0)
    return emb.reshape(*original_shape[:-1], d_out)


if __name__ == "__main__":
    key = jax.random.PRNGKey(0)

    # Cases mirroring RayTransformer usage:
    #   default encoder, dircode (num_freqs=4, d_in=3, include_input=True),
    #   depthcode (num_freqs=4, d_in=1).
    cases = [
        ((2, 4, 16, 3), 6, 3, False),
        ((64, 3, 3), 4, 3, True),
        ((6, 128, 1), 4, 1, False),
    ]

    ok = True
    for shape, nf, di, inc in cases:
        key, sub = jax.random.split(key)
        x = jax.random.normal(sub, shape, dtype=jnp.float32)

        enc = PositionalEncodingNeRFPallas(
            num_freqs=nf, d_in=di, freq_factor=np.pi, include_input=inc)
        out = jax.block_until_ready(enc(x))
        ref = _reference(x, nf, di, np.pi, inc)

        expected_shape = shape[:-1] + (enc.d_out,)
        if tuple(out.shape) != expected_shape:
            ok = False
            continue
        # Tolerance allows for ULP-level sin/range-reduction differences between
        # the Mosaic and XLA sine implementations at |arg| up to ~32*pi*|x|;
        # structural/layout bugs produce O(1) errors and still fail decisively.
        if not np.allclose(np.asarray(out), np.asarray(ref),
                           atol=1e-3, rtol=1e-3):
            ok = False

    if ok:
        print("KERNEL_OK")
    else:
        print("KERNEL_MISMATCH")
</pallas_src>

<mosaic_0001>
module attributes {stable_mosaic.version = 11 : i64} {
  func.func @_penc_kernel(%arg0: i32, %arg1: memref<128x3xf32, #tpu.memory_space<vmem>>, %arg2: memref<3x36xf32, #tpu.memory_space<vmem>>, %arg3: memref<1x36xf32, #tpu.memory_space<vmem>>, %arg4: memref<1x36xf32, #tpu.memory_space<vmem>>, %arg5: memref<128x36xf32, #tpu.memory_space<vmem>>) attributes {dimension_semantics = [#tpu.dimension_semantics<parallel>], iteration_bounds = array<i64: 1>, scalar_prefetch = 0 : i64, scratch_operands = 0 : i64, tpu.core_type = #tpu.core_type<tc>, window_params = [{transform_indices = @transform_0, window_bounds = array<i64: 128, 3>}, {pipeline_mode = #tpu.pipeline_mode<synchronous>, transform_indices = @transform_1, window_bounds = array<i64: 3, 36>}, {pipeline_mode = #tpu.pipeline_mode<synchronous>, transform_indices = @transform_2, window_bounds = array<i64: 1, 36>}, {pipeline_mode = #tpu.pipeline_mode<synchronous>, transform_indices = @transform_3, window_bounds = array<i64: 1, 36>}, {transform_indices = @transform_4, window_bounds = array<i64: 128, 36>}]} {
    %c0 = arith.constant 0 : index
    %c0_0 = arith.constant 0 : index
    %0 = vector.load %arg1[%c0, %c0_0] : memref<128x3xf32, #tpu.memory_space<vmem>>, vector<128x3xf32>
    %c0_1 = arith.constant 0 : index
    %c0_2 = arith.constant 0 : index
    %1 = vector.load %arg2[%c0_1, %c0_2] : memref<3x36xf32, #tpu.memory_space<vmem>>, vector<3x36xf32>
    %2 = vector.extract_strided_slice %0 {offsets = [0, 0], sizes = [128, 1], strides = [1, 1]} : vector<128x3xf32> to vector<128x1xf32>
    %3 = vector.extract_strided_slice %1 {offsets = [0, 0], sizes = [1, 36], strides = [1, 1]} : vector<3x36xf32> to vector<1x36xf32>
    %4 = vector.broadcast %2 : vector<128x1xf32> to vector<128x36xf32>
    %5 = vector.broadcast %3 : vector<1x36xf32> to vector<128x36xf32>
    %6 = arith.mulf %4, %5 : vector<128x36xf32>
    %7 = vector.extract_strided_slice %0 {offsets = [0, 1], sizes = [128, 1], strides = [1, 1]} : vector<128x3xf32> to vector<128x1xf32>
    %8 = vector.extract_strided_slice %1 {offsets = [1, 0], sizes = [1, 36], strides = [1, 1]} : vector<3x36xf32> to vector<1x36xf32>
    %9 = vector.broadcast %7 : vector<128x1xf32> to vector<128x36xf32>
    %10 = vector.broadcast %8 : vector<1x36xf32> to vector<128x36xf32>
    %11 = arith.mulf %9, %10 : vector<128x36xf32>
    %12 = arith.addf %6, %11 : vector<128x36xf32>
    %13 = vector.extract_strided_slice %0 {offsets = [0, 2], sizes = [128, 1], strides = [1, 1]} : vector<128x3xf32> to vector<128x1xf32>
    %14 = vector.extract_strided_slice %1 {offsets = [2, 0], sizes = [1, 36], strides = [1, 1]} : vector<3x36xf32> to vector<1x36xf32>
    %15 = vector.broadcast %13 : vector<128x1xf32> to vector<128x36xf32>
    %16 = vector.broadcast %14 : vector<1x36xf32> to vector<128x36xf32>
    %17 = arith.mulf %15, %16 : vector<128x36xf32>
    %18 = arith.addf %12, %17 : vector<128x36xf32>
    %c0_3 = arith.constant 0 : index
    %c0_4 = arith.constant 0 : index
    %19 = vector.load %arg3[%c0_3, %c0_4] : memref<1x36xf32, #tpu.memory_space<vmem>>, vector<1x36xf32>
    %20 = vector.broadcast %19 : vector<1x36xf32> to vector<128x36xf32>
    %21 = arith.mulf %18, %20 : vector<128x36xf32>
    %c0_5 = arith.constant 0 : index
    %c0_6 = arith.constant 0 : index
    %22 = vector.load %arg4[%c0_5, %c0_6] : memref<1x36xf32, #tpu.memory_space<vmem>>, vector<1x36xf32>
    %23 = vector.broadcast %22 : vector<1x36xf32> to vector<128x36xf32>
    %24 = arith.addf %21, %23 : vector<128x36xf32>
    %25 = math.sin %24 : vector<128x36xf32>
    %c0_7 = arith.constant 0 : index
    %c0_8 = arith.constant 0 : index
    %26 = vector.load %arg5[%c0_7, %c0_8] : memref<128x36xf32, #tpu.memory_space<vmem>>, vector<128x36xf32>
    tpu.vector_store %arg5[%c0_7, %c0_8], %25 {strides = array<i32>} : memref<128x36xf32, #tpu.memory_space<vmem>>, vector<128x36xf32>,
    return
  }
  func.func @transform_0(%arg0: i32) -> (i32, i32) {
    %c0_i32 = arith.constant 0 : i32
    %c0_i32_0 = arith.constant 0 : i32
    return %arg0, %c0_i32 : i32, i32
  }
  func.func @transform_1(%arg0: i32) -> (i32, i32) {
    %c0_i32 = arith.constant 0 : i32
    %c0_i32_0 = arith.constant 0 : i32
    %c0_i32_1 = arith.constant 0 : i32
    return %c0_i32, %c0_i32_0 : i32, i32
  }
  func.func @transform_2(%arg0: i32) -> (i32, i32) {
    %c0_i32 = arith.constant 0 : i32
    %c0_i32_0 = arith.constant 0 : i32
    %c0_i32_1 = arith.constant 0 : i32
    return %c0_i32, %c0_i32_0 : i32, i32
  }
  func.func @transform_3(%arg0: i32) -> (i32, i32) {
    %c0_i32 = arith.constant 0 : i32
    %c0_i32_0 = arith.constant 0 : i32
    %c0_i32_1 = arith.constant 0 : i32
    return %c0_i32, %c0_i32_0 : i32, i32
  }
  func.func @transform_4(%arg0: i32) -> (i32, i32) {
    %c0_i32 = arith.constant 0 : i32
    %c0_i32_0 = arith.constant 0 : i32
    return %arg0, %c0_i32 : i32, i32
  }
}

</mosaic_0001>

<bundles_post_ra>
// kernel: tpu_custom_call.1
= control target key start
LH: loop header
LB: loop body
LE: loop exit
PB: predicated region body
PF: predicated region fallthrough
CT: control target
= control target key end

     0   :  { %v2278_v0 = vmov 0   ;;  %v2279_v17 = vmov 1   ;;  %v2280_v18 = vmov 2   ;;  %v114_v19 = vlaneseq  ;;  %s3775_s0 = inlined_call_operand.vmem [shape: f32[128,3], index: 0, kind: input, shape index: {}]   ;;  %s3776_s1 = inlined_call_operand.vmem [shape: f32[3,36], index: 1, kind: input, shape index: {}]   ;;  %s3777_s2 = inlined_call_operand.vmem [shape: f32[1,36], index: 2, kind: input, shape index: {}]   ;;  %s3778_s3 = inlined_call_operand.vmem [shape: f32[1,36], index: 3, kind: input, shape index: {}]   ;;  %s3779_s4 = inlined_call_operand.vmem [shape: f32[128,36], index: 4, kind: output, shape index: {}]  }
   0x1   :  { %2205 = vset.pattern.permute.xlu1 %v2278_v0  ;;  %2204 = vset.pattern.permute.xlu0 %v2278_v0  ;;  %v19_v1 = vld [vmem:[%s3775_s0 + $0x10] sm:$0xff]  ;;  %v17_v2 = vld [vmem:[%s3775_s0] sm:$0xff]  ;;  %v20_v3 = vld [vmem:[%s3775_s0 + $0x18] sm:$0xff] }
   0x2   :  { %46 = vperm.xlu1 %2205, %v19_v1   ;;  %36 = vperm.xlu0 %2204, %v17_v2   ;;  %v18_v4 = vld [vmem:[%s3775_s0 + $0x8] sm:$0xff]  ;;  %v21_v6 = vld [vmem:[%s3775_s0 + $0x20] sm:$0xff]  ;;  %v24_v7 = vld [vmem:[%s3775_s0 + $0x38] sm:$0xff]  ;;  %v2360_v20 = vshrl.u32 %v114_v19, 7 }
   0x3   :  { %v22_v5 = vld [vmem:[%s3775_s0 + $0x28] sm:$0xff]  ;;  %v23_v8 = vld [vmem:[%s3775_s0 + $0x30] sm:$0xff]  ;;  %v25_v10 = vld [vmem:[%s3775_s0 + $0x40] sm:$0xff] }
   0x4   :  { %v26_v9 = vld [vmem:[%s3775_s0 + $0x48] sm:$0xff]  ;;  %v28_v11 = vld [vmem:[%s3775_s0 + $0x58] sm:$0xff]  ;;  %v27_v12 = vld [vmem:[%s3775_s0 + $0x50] sm:$0xff]  ;;  %v116_v21 = vsub.s32 0, %v2360_v20  ;;  %v200_v52 = vsub.s32 1, %v2360_v20 }
   0x5   :  { %v30_v13 = vld [vmem:[%s3775_s0 + $0x68] sm:$0xff]  ;;  %v29_v14 = vld [vmem:[%s3775_s0 + $0x60] sm:$0xff]  ;;  %v32_v15 = vld [vmem:[%s3775_s0 + $0x78] sm:$0xff] }
   0x6   :  { %51 = vperm.xlu1 %2205, %v20_v3   ;;  %41 = vperm.xlu0 %2204, %v18_v4   ;;  %v31_v16 = vld [vmem:[%s3775_s0 + $0x70] sm:$0xff]  ;;  %v2366_v22 = vld [vmem:[%s3776_s1] sm:$0x7] }
   0x7   :  { %v2373_v25 = vrot.slane %v2366_v22, %v116_v21  ;;  %v201_v55 = vrot.slane %v2366_v22, %v200_v52 }
   0xa   :  { %61 = vperm.xlu1 %2205, %v22_v5   ;;  %56 = vperm.xlu0 %2204, %v21_v6  }
   0xe   :  { %71 = vperm.xlu1 %2205, %v24_v7   ;;  %66 = vperm.xlu0 %2204, %v23_v8  }
  0x12   :  { %81 = vperm.xlu1 %2205, %v26_v9   ;;  %76 = vperm.xlu0 %2204, %v25_v10  }
  0x16   :  { %91 = vperm.xlu1 %2205, %v28_v11   ;;  %86 = vperm.xlu0 %2204, %v27_v12  }
  0x1a   :  { %101 = vperm.xlu1 %2205, %v30_v13   ;;  %96 = vperm.xlu0 %2204, %v29_v14  }
  0x1e   :  { %111 = vperm.xlu1 %2205, %v32_v15   ;;  %106 = vperm.xlu0 %2204, %v31_v16  }
  0x22   :  { %2207 = vset.pattern.permute.xlu1 %v2279_v17  ;;  %2206 = vset.pattern.permute.xlu0 %v2279_v17 }
  0x23   :  { %139 = vperm.xlu1 %2207, %v18_v4   ;;  %135 = vperm.xlu0 %2206, %v17_v2  }
  0x27   :  { %143 = vperm.xlu1 %2207, %v19_v1   ;;  %147 = vperm.xlu0 %2206, %v20_v3  }
  0x2b   :  { %151 = vperm.xlu1 %2207, %v21_v6   ;;  %155 = vperm.xlu0 %2206, %v22_v5  }
  0x2f   :  { %159 = vperm.xlu1 %2207, %v23_v8   ;;  %163 = vperm.xlu0 %2206, %v24_v7  }
  0x33   :  { %167 = vperm.xlu1 %2207, %v25_v10   ;;  %171 = vperm.xlu0 %2206, %v26_v9  }
  0x37   :  { %175 = vperm.xlu1 %2207, %v27_v12   ;;  %179 = vperm.xlu0 %2206, %v28_v11  }
  0x3b   :  { %183 = vperm.xlu1 %2207, %v29_v14   ;;  %187 = vperm.xlu0 %2206, %v30_v13  }
  0x3f   :  { %191 = vperm.xlu1 %2207, %v31_v16   ;;  %195 = vperm.xlu0 %2206, %v32_v15  }
  0x43   :  { %2208 = vset.pattern.permute.xlu1 %v2280_v18  ;;  %2209 = vset.pattern.permute.xlu0 %v2280_v18 }
  0x44   :  { %235 = vperm.xlu1 %2208, %v17_v2   ;;  %239 = vperm.xlu0 %2209, %v18_v4  }
  0x48   :  { %243 = vperm.xlu1 %2208, %v19_v1   ;;  %251 = vperm.xlu0 %2209, %v21_v6  }
  0x4c   :  { %247 = vperm.xlu1 %2208, %v20_v3   ;;  %259 = vperm.xlu0 %2209, %v23_v8  }
  0x50   :  { %255 = vperm.xlu1 %2208, %v22_v5   ;;  %267 = vperm.xlu0 %2209, %v25_v10  }
  0x54   :  { %263 = vperm.xlu1 %2208, %v24_v7   ;;  %275 = vperm.xlu0 %2209, %v27_v12  }
  0x58   :  { %271 = vperm.xlu1 %2208, %v26_v9   ;;  %283 = vperm.xlu0 %2209, %v29_v14  }
  0x5c   :  { %279 = vperm.xlu1 %2208, %v28_v11   ;;  %291 = vperm.xlu0 %2209, %v31_v16  }
  0x60   :  { %287 = vperm.xlu1 %2208, %v30_v13  }
  0x64   :  { %295 = vperm.xlu1 %2208, %v32_v15  }
  0x7d   :  { %v2368_v23 = vpop.permute.xlu1 %46  ;;  %v2370_v24 = vpop.permute.xlu0 %36 }
  0x81   :  { %v52_v26 = vpop.permute.xlu1 %51  ;;  %v2375_v27 = vpop.permute.xlu0 %41 }
  0x82   :  { %v121_v28 = vmul.f32 %v2373_v25, %v52_v26 }
  0x85   :  { %v62_v29 = vpop.permute.xlu1 %61  ;;  %v57_v30 = vpop.permute.xlu0 %56 }
  0x86   :  { %v123_v31 = vmul.f32 %v2373_v25, %v62_v29  ;;  %v122_v62 = vmul.f32 %v2373_v25, %v57_v30 }
  0x89   :  { %v72_v32 = vpop.permute.xlu1 %71  ;;  %v67_v33 = vpop.permute.xlu0 %66 }
  0x8a   :  { %v125_v34 = vmul.f32 %v2373_v25, %v72_v32  ;;  %v124_v35 = vmul.f32 %v2373_v25, %v67_v33 }
  0x8d   :  { %v82_v36 = vpop.permute.xlu1 %81  ;;  %v77_v37 = vpop.permute.xlu0 %76 }
  0x8e   :  { %v127_v38 = vmul.f32 %v2373_v25, %v82_v36  ;;  %v126_v39 = vmul.f32 %v2373_v25, %v77_v37 }
  0x91   :  { %v92_v40 = vpop.permute.xlu1 %91  ;;  %v87_v41 = vpop.permute.xlu0 %86 }
  0x92   :  { %v129_v42 = vmul.f32 %v2373_v25, %v92_v40  ;;  %v128_v43 = vmul.f32 %v2373_v25, %v87_v41  ;;  %v119_v41 = vmul.f32 %v2373_v25, %v2375_v27  ;;  %v2431_v27 = vld [vmem:[%s3777_s2] ss:$0 sm:$0xff] }
  0x95   :  { %v102_v44 = vpop.permute.xlu1 %101  ;;  %v97_v45 = vpop.permute.xlu0 %96 }
  0x96   :  { %v131_v46 = vmul.f32 %v2373_v25, %v102_v44  ;;  %v130_v47 = vmul.f32 %v2373_v25, %v97_v45 }
  0x99   :  { %v112_v48 = vpop.permute.xlu1 %111  ;;  %v107_v49 = vpop.permute.xlu0 %106 }
  0x9a   :  { %v133_v50 = vmul.f32 %v2373_v25, %v112_v48  ;;  %v132_v51 = vmul.f32 %v2373_v25, %v107_v49 }
  0x9e   :  { %v140_v53 = vpop.permute.xlu1 %139  ;;  %v136_v54 = vpop.permute.xlu0 %135 }
  0x9f   :  { %v203_v36 = vmul.f32 %v201_v55, %v140_v53 }
  0xa1   :  { %v219_v44 = vadd.f32 %v203_v36, %v119_v41 }
  0xa2   :  { %v144_v56 = vpop.permute.xlu1 %143  ;;  %v148_v57 = vpop.permute.xlu0 %147 }
  0xa3   :  { %v205_v58 = vmul.f32 %v201_v55, %v148_v57  ;;  %v204_v48 = vmul.f32 %v201_v55, %v144_v56 }
  0xa5   :  { %v2391_v59 = vadd.f32 %v205_v58, %v121_v28 }
  0xa6   :  { %v152_v60 = vpop.permute.xlu1 %151  ;;  %v156_v61 = vpop.permute.xlu0 %155 }
  0xa7   :  { %v206_v63 = vmul.f32 %v201_v55, %v152_v60  ;;  %v207_v0 = vmul.f32 %v201_v55, %v156_v61 }
  0xa9   :  { %v2394_v1 = vadd.f32 %v206_v63, %v122_v62  ;;  %v2396_v2 = vadd.f32 %v207_v0, %v123_v31  ;;  %v300_v31 = vsub.s32 2, %v2360_v20  ;;  %v118_v20 = vmul.f32 %v2373_v25, %v2370_v24  ;;  %v2438_v24 = vld [vmem:[%s3778_s3] ss:$0 sm:$0xff] }
  0xaa   :  { %v160_v3 = vpop.permute.xlu1 %159  ;;  %v164_v4 = vpop.permute.xlu0 %163 }
  0xab   :  { %v208_v5 = vmul.f32 %v201_v55, %v160_v3  ;;  %v209_v6 = vmul.f32 %v201_v55, %v164_v4  ;;  %v2416_v40 = vrot.slane %v2366_v22, %v300_v31 }
  0xad   :  { %v2398_v7 = vadd.f32 %v208_v5, %v124_v35  ;;  %v2400_v8 = vadd.f32 %v209_v6, %v125_v34 }
  0xae   :  { %v168_v9 = vpop.permute.xlu1 %167  ;;  %v172_v10 = vpop.permute.xlu0 %171 }
  0xaf   :  { %v210_v11 = vmul.f32 %v201_v55, %v168_v9  ;;  %v211_v12 = vmul.f32 %v201_v55, %v172_v10 }
  0xb1   :  { %v2402_v13 = vadd.f32 %v210_v11, %v126_v39  ;;  %v2404_v14 = vadd.f32 %v211_v12, %v127_v38  ;;  %v202_v39 = vmul.f32 %v201_v55, %v136_v54 }
  0xb2   :  { %v176_v15 = vpop.permute.xlu1 %175  ;;  %v180_v16 = vpop.permute.xlu0 %179 }
  0xb3   :  { %v212_v17 = vmul.f32 %v201_v55, %v176_v15  ;;  %v213_v18 = vmul.f32 %v201_v55, %v180_v16 }
  0xb5   :  { %v2406_v19 = vadd.f32 %v212_v17, %v128_v43  ;;  %v2408_v21 = vadd.f32 %v213_v18, %v129_v42 }
  0xb6   :  { %v184_v26 = vpop.permute.xlu1 %183  ;;  %v188_v28 = vpop.permute.xlu0 %187 }
  0xb7   :  { %v214_v29 = vmul.f32 %v201_v55, %v184_v26  ;;  %v215_v30 = vmul.f32 %v201_v55, %v188_v28 }
  0xb9   :  { %v2411_v32 = vadd.f32 %v214_v29, %v130_v47  ;;  %v2413_v33 = vadd.f32 %v215_v30, %v131_v46  ;;  %v218_v47 = vadd.f32 %v202_v39, %v118_v20 }
  0xba   :  { %v192_v34 = vpop.permute.xlu1 %191  ;;  %v196_v35 = vpop.permute.xlu0 %195 }
  0xbb   :  { %v216_v37 = vmul.f32 %v201_v55, %v192_v34  ;;  %v217_v38 = vmul.f32 %v201_v55, %v196_v35 }
  0xbd   :  { %v2420_v42 = vadd.f32 %v216_v37, %v132_v51  ;;  %v2422_v43 = vadd.f32 %v217_v38, %v133_v50  ;;  %v120_v50 = vmul.f32 %v2373_v25, %v2368_v23 }
  0xbf   :  { %v236_v45 = vpop.permute.xlu1 %235  ;;  %v240_v46 = vpop.permute.xlu0 %239  ;;  %v220_v54 = vadd.f32 %v204_v48, %v120_v50  ;;  %v2282_v48 = vmov 2475754826  }
  0xc0   :  { %v302_v49 = vmul.f32 %v2416_v40, %v236_v45  ;;  %v303_v22 = vmul.f32 %v2416_v40, %v240_v46 }
  0xc2   :  { %v318_v51 = vadd.f32 %v302_v49, %v218_v47  ;;  %v319_v52 = vadd.f32 %v303_v22, %v219_v44  ;;  %v2281_v44 = vmov 683565275   ;;  %v2283_v22 = vmov 2131351028  }
  0xc3   :  { %v244_v53 = vpop.permute.xlu1 %243  ;;  %v252_v60 = vpop.permute.xlu0 %251 }
  0xc4   :  { %v341_v55 = vmul.f32 %v2431_v27, %v318_v51  ;;  %v342_v56 = vmul.f32 %v2431_v27, %v319_v52  ;;  %v304_v57 = vmul.f32 %v2416_v40, %v244_v53  ;;  %v306_v5 = vmul.f32 %v2416_v40, %v252_v60 }
  0xc5   :  { %v2284_v51 = vmov 2102212464   ;;  %v2285_v53 = vmov 920167782  }
  0xc6   :  { %v2444_v58 = vadd.f32 %v2438_v24, %v341_v55  ;;  %v2447_v23 = vadd.f32 %v2438_v24, %v342_v56  ;;  %v320_v25 = vadd.f32 %v304_v57, %v220_v54  ;;  %v322_v17 = vadd.f32 %v306_v5, %v2394_v1 }
  0xc8   :  { %v380_v61 = vand.u32 2147483647, %v2444_v58  ;;  %v383_v62 = vand.u32 2139095040, %v2444_v58  ;;  %v484_v63 = vand.u32 2147483647, %v2447_v23  ;;  %v487_v0 = vand.u32 2139095040, %v2447_v23 }
  0xc9   :  { %v343_v4 = vmul.f32 %v2431_v27, %v320_v25  ;;  %v2465_v37 = vmul.f32 %v2431_v27, %v322_v17  ;;  %vm382_vm13 = vcmp.lt.s32.totalorder %v2444_v58, 0  ;;  %vm486_vm14 = vcmp.lt.s32.totalorder %v2447_v23, 0 }
  0xca   :  { %v384_v3 = vshrl.u32 %v383_v62, 23  ;;  %v387_v6 = vand.u32 8388607, %v380_v61  ;;  %v488_v9 = vshrl.u32 %v487_v0, 23  ;;  %v491_v10 = vand.u32 8388607, %v484_v63 }
  0xcb   :  { %v2460_v12 = vadd.f32 %v2438_v24, %v343_v4  ;;  %v2286_v62 = vmov 1326507024  }
  0xcc   :  { %v2067_v11 = vadd.s32 4294967169, %v384_v3  ;;  %v2071_v15 = vadd.s32 4294967169, %v488_v9  ;;  %v388_v18 = vor.u32 8388608, %v387_v6  ;;  %v492_v26 = vor.u32 8388608, %v491_v10 }
  0xcd   :  { %v591_v29 = vand.u32 2139095040, %v2460_v12  ;;  %v3780_v41 = vand.u32 2147483647, %v2460_v12 }
  0xce   :  { %v390_v16 = vadd.s32 1, %v2067_v11  ;;  %v494_v28 = vadd.s32 1, %v2071_v15  ;;  %v2467_v38 = vshll.u32 %v388_v18, 8  ;;  %v2471_v1 = vshll.u32 %v492_v26, 8 }
  0xcf   :  { %v592_v31 = vshrl.u32 %v591_v29, 23 }
  0xd0   :  { %vm391_vm0 = vcmp.gt.s32.totalorder %v390_v16, 0  ;;  %vm495_vm1 = vcmp.gt.s32.totalorder %v494_v28, 0 }
  0xd1   :  { %v392_v30 = vsel %vm391_vm0, %v390_v16, 0  ;;  %v496_v36 = vsel %vm495_vm1, %v494_v28, 0  ;;  %v2475_v47 = vadd.s32 4294967169, %v592_v31  ;;  %vm2586_vm1 = vcmp.le.f32.partialorder %v380_v61, 0.7853982 }
  0xd2   :  { %v393_v34 = vshrl.u32 %v392_v30, 5  ;;  %v394_v35 = vand.u32 31, %v392_v30  ;;  %v2469_v39 = vshrl.u32 %v496_v36, 5  ;;  %v498_v46 = vand.u32 31, %v496_v36 }
  0xd4   :  { %v395_v20 = vsub.s32 32, %v394_v35  ;;  %v397_v45 = vshll.u32 %v2281_v44, %v394_v35  ;;  %v400_v49 = vshll.u32 %v2282_v48, %v394_v35  ;;  %v403_v50 = vshll.u32 %v2283_v22, %v394_v35 }
  0xd5   :  { %v406_v52 = vshll.u32 %v2284_v51, %v394_v35  ;;  %v409_v54 = vshll.u32 %v2285_v53, %v394_v35  ;;  %vm412_vm2 = vcmp.lt.s32.totalorder %v393_v34, 1  ;;  %vm413_vm3 = vcmp.lt.s32.totalorder %v393_v34, 2 }
  0xd6   :  { %v398_v55 = vshrl.u32 %v2282_v48, %v395_v20  ;;  %v401_v56 = vshrl.u32 %v2283_v22, %v395_v20  ;;  %v404_v57 = vshrl.u32 %v2284_v51, %v395_v20  ;;  %v396_v25 = vshrl.u32 %v2281_v44, %v395_v20 }
  0xd7   :  { %v407_v60 = vshrl.u32 %v2285_v53, %v395_v20  ;;  %v410_v0 = vshrl.u32 %v2286_v62, %v395_v20  ;;  %v499_v6 = vsub.s32 32, %v498_v46  ;;  %vm414_vm4 = vcmp.lt.s32.totalorder %v393_v34, 3 }
  0xd8   :  { %v399_v3 = vor.u32 %v398_v55, %v397_v45  ;;  %v402_v4 = vor.u32 %v401_v56, %v400_v49  ;;  %v405_v5 = vor.u32 %v404_v57, %v403_v50  ;;  %vm415_vm5 = vcmp.lt.s32.totalorder %v393_v34, 4 }
  0xd9   :  { %v408_v9 = vor.u32 %v407_v60, %v406_v52  ;;  %v411_v10 = vor.u32 %v410_v0, %v409_v54  ;;  %v501_v29 = vshll.u32 %v2281_v44, %v498_v46  ;;  %v502_v35 = vshrl.u32 %v2282_v48, %v499_v6 }
  0xda   :  { %v416_v11 = vsel %vm412_vm2, %v396_v25, %v399_v3  ;;  %v417_v15 = vsel %vm415_vm5, %v405_v5, 2102212464  ;;  %v420_v16 = vsel %vm412_vm2, %v399_v3, %v402_v4  ;;  %v424_v17 = vsel %vm412_vm2, %v402_v4, %v405_v5 }
  0xdb   :  { %v418_v18 = vsel %vm414_vm4, %v402_v4, %v417_v15  ;;  %v421_v26 = vsel %vm415_vm5, %v408_v9, 920167782  ;;  %v425_v28 = vsel %vm415_vm5, %v411_v10, 1326507024  ;;  %v504_v36 = vshll.u32 %v2282_v48, %v498_v46 }
  0xdc   :  { %v422_v30 = vsel %vm414_vm4, %v405_v5, %v421_v26  ;;  %v426_v31 = vsel %vm414_vm4, %v408_v9, %v425_v28  ;;  %v419_v20 = vsel %vm413_vm3, %v416_v11, %v418_v18  ;;  %v505_v50 = vshrl.u32 %v2283_v22, %v499_v6 }
  0xdd   :  { %v423_v45 = vsel %vm413_vm3, %v420_v16, %v422_v30  ;;  %v427_v49 = vsel %vm413_vm3, %v424_v17, %v426_v31  ;;  %v503_v57 = vor.u32 %v502_v35, %v501_v29  ;;  %v507_v60 = vshll.u32 %v2283_v22, %v498_v46 }
  0xde   :  { %v2498_v52 = vmul.u32.u64.low %v2467_v38, %v427_v49  ;;  %v2499_v54 = vmul.u32.u64.high %v2467_v38, %v427_v49, %v2498_v52  ;;  %v2502_v55 = vmul.u32.u64.low %v2467_v38, %v423_v45  ;;  %v2503_v56 = vmul.u32.u64.high %v2467_v38, %v423_v45, %v2502_v55 }
  0xdf   :  { %v506_v25 = vor.u32 %v505_v50, %v504_v36  ;;  %v508_v0 = vshrl.u32 %v2284_v51, %v499_v6  ;;  %v500_v3 = vshrl.u32 %v2281_v44, %v499_v6  ;;  %v510_v34 = vshll.u32 %v2284_v51, %v498_v46 }
  0xe0   :  { %v511_v4 = vshrl.u32 %v2285_v53, %v499_v6  ;;  %v514_v5 = vshrl.u32 %v2286_v62, %v499_v6  ;;  %v435_v9 = vmul.u32 %v2467_v38, %v419_v20  ;;  %v513_v11 = vshll.u32 %v2285_v53, %v498_v46 }
  0xe1   :  { %v509_v10 = vor.u32 %v508_v0, %v507_v60  ;;  %vm516_vm6 = vcmp.lt.s32.totalorder %v2469_v39, 1  ;;  %vm437_vm7 = vc.u32 %v2499_v54, %v2502_v55  ;;  %v438_v15 = vadd.s32 1, %v2503_v56 }
  0xe2   :  { %v512_v16 = vor.u32 %v511_v4, %v510_v34  ;;  %vm517_vm8 = vcmp.lt.s32.totalorder %v2469_v39, 2  ;;  %v515_v17 = vor.u32 %v514_v5, %v513_v11  ;;  %vm518_vm9 = vcmp.lt.s32.totalorder %v2469_v39, 3 }
  0xe3   :  { %vm519_vm10 = vcmp.lt.s32.totalorder %v2469_v39, 4  ;;  %v524_v6 = vsel %vm516_vm6, %v503_v57, %v506_v25  ;;  %v439_v38 = vsel %vm437_vm7, %v438_v15, %v2503_v56  ;;  %v528_v46 = vsel %vm516_vm6, %v506_v25, %v509_v10 }
  0xe4   :  { %v521_v18 = vsel %vm519_vm10, %v509_v10, 2102212464  ;;  %v525_v26 = vsel %vm519_vm10, %v512_v16, 920167782  ;;  %v440_v28 = vadd.s32 %v439_v38, %v435_v9  ;;  %v520_v29 = vsel %vm516_vm6, %v500_v3, %v503_v57 }
  0xe5   :  { %v526_v30 = vsel %vm518_vm9, %v509_v10, %v525_v26  ;;  %v529_v31 = vsel %vm519_vm10, %v515_v17, 1326507024  ;;  %v522_v35 = vsel %vm518_vm9, %v506_v25, %v521_v18  ;;  %v598_v45 = vadd.s32 1, %v2475_v47  ;;  %v248_v10 = vpop.permute.xlu1 %247  ;;  %v260_v17 = vpop.permute.xlu0 %259 }
  0xe6   :  { %v527_v36 = vsel %vm517_vm8, %v524_v6, %v526_v30  ;;  %v530_v20 = vsel %vm518_vm9, %v512_v16, %v529_v31  ;;  %v441_v49 = vadd.s32 536870912, %v440_v28  ;;  %v595_v25 = vand.u32 8388607, %v3780_v41 }
  0xe7   :  { %v531_v50 = vsel %vm517_vm8, %v528_v46, %v530_v20  ;;  %v2526_v52 = vmul.u32.u64.low %v2471_v1, %v527_v36  ;;  %v2527_v56 = vmul.u32.u64.high %v2471_v1, %v527_v36, %v2526_v52  ;;  %vm599_vm11 = vcmp.gt.s32.totalorder %v598_v45, 0 }
  0xe8   :  { %v2531_v57 = vmul.u32.u64.low %v2471_v1, %v531_v50  ;;  %v2532_v60 = vmul.u32.u64.high %v2471_v1, %v531_v50, %v2531_v57  ;;  %v442_v0 = vshrl.u32 %v441_v49, 30  ;;  %v523_v47 = vsel %vm517_vm8, %v520_v29, %v522_v35 }
  0xe9   :  { %v600_v3 = vsel %vm599_vm11, %v598_v45, 0  ;;  %v542_v5 = vadd.s32 1, %v2527_v56  ;;  %v2541_v9 = vadd.f32 %v2438_v24, %v2465_v37  ;;  %v539_v11 = vmul.u32 %v2471_v1, %v523_v47 }
  0xea   :  { %v602_v34 = vand.u32 31, %v600_v3  ;;  %v443_v4 = vshll.u32 %v442_v0, 30  ;;  %vm541_vm12 = vc.u32 %v2532_v60, %v2526_v52  ;;  %v596_v15 = vor.u32 8388608, %v595_v25 }
  0xeb   :  { %v543_v6 = vsel %vm541_vm12, %v542_v5, %v2527_v56  ;;  %v2551_v18 = vmul.f32 %v2416_v40, %v248_v10  ;;  %v436_v37 = vadd.s32 %v2502_v55, %v2499_v54  ;;  %v796_v26 = vand.u32 2147483647, %v2541_v9 }
  0xec   :  { %v603_v16 = vsub.s32 32, %v602_v34  ;;  %v2546_v39 = vsub.s32 %v440_v28, %v443_v4  ;;  %v544_v38 = vadd.s32 %v543_v6, %v539_v11  ;;  %v2557_v46 = vmul.f32 %v2416_v40, %v260_v17 }
  0xed   :  { %v2560_v30 = vshll.u32 %v596_v15, 8  ;;  %v799_v31 = vand.u32 2139095040, %v2541_v9  ;;  %v2564_v36 = vshrl.u32 %v600_v3, 5  ;;  %v466_v20 = vsub.s32 4, %v442_v0 }
  0xee   :  { %v446_v1 = vsub.s32 0, %v2546_v39  ;;  %v545_v29 = vadd.s32 536870912, %v544_v38  ;;  %v606_v28 = vshrl.u32 %v2282_v48, %v603_v16  ;;  %v609_v54 = vshrl.u32 %v2283_v22, %v603_v16 }
  0xef   :  { %v612_v55 = vshrl.u32 %v2284_v51, %v603_v16  ;;  %v605_v49 = vshll.u32 %v2281_v44, %v602_v34  ;;  %v615_v50 = vshrl.u32 %v2285_v53, %v603_v16  ;;  %v608_v57 = vshll.u32 %v2282_v48, %v602_v34 }
  0xf0   :  { %v2068_v35 = vmin.u32 %v446_v1, %v2546_v39  ;;  %v546_v45 = vshrl.u32 %v545_v29, 30  ;;  %v611_v25 = vshll.u32 %v2283_v22, %v602_v34  ;;  %v618_v47 = vshrl.u32 %v2286_v62, %v603_v16 }
  0xf1   :  { %v607_v3 = vor.u32 %v606_v28, %v605_v49  ;;  %v614_v5 = vshll.u32 %v2284_v51, %v602_v34  ;;  %v800_v10 = vshrl.u32 %v799_v31, 23  ;;  %v610_v15 = vor.u32 %v609_v54, %v608_v57 }
  0xf2   :  { %v448_v56 = vclz %v2068_v35  ;;  %v547_v4 = vshll.u32 %v546_v45, 30  ;;  %v613_v17 = vor.u32 %v612_v55, %v611_v25  ;;  %v617_v6 = vshll.u32 %v2285_v53, %v602_v34 }
  0xf3   :  { %v2577_v1 = vsel %vm382_vm13, %v466_v20, %v442_v0  ;;  %v604_v35 = vshrl.u32 %v2281_v44, %v603_v16  ;;  %v616_v41 = vor.u32 %v615_v50, %v614_v5  ;;  %v570_v28 = vsub.s32 4, %v546_v45 }
  0xf4   :  { %v2069_v11 = vadd.s32 4294967294, %v448_v56  ;;  %v2580_v29 = vsub.s32 %v544_v38, %v547_v4  ;;  %v619_v49 = vor.u32 %v618_v47, %v617_v6  ;;  %vm620_vm0 = vcmp.lt.s32.totalorder %v2564_v36, 1 }
  0xf5   :  { %vm622_vm2 = vcmp.lt.s32.totalorder %v2564_v36, 3  ;;  %vm623_vm3 = vcmp.lt.s32.totalorder %v2564_v36, 4  ;;  %vm2595_vm4 = vcmp.le.f32.partialorder %v484_v63, 0.7853982  ;;  %v628_v61 = vsel %vm620_vm0, %v607_v3, %v610_v15 }
  0xf6   :  { %vm2070_vm15 = vcmp.lt.s32.totalorder %v2069_v11, 0  ;;  %v550_v31 = vsub.s32 0, %v2580_v29  ;;  %v625_v55 = vsel %vm623_vm3, %v613_v17, 2102212464  ;;  %v629_v56 = vsel %vm623_vm3, %v616_v41, 920167782 }
  0xf7   :  { %v451_v0 = vsel %vm2070_vm15, 0, %v2069_v11  ;;  %v632_v57 = vsel %vm620_vm0, %v610_v15, %v613_v17  ;;  %v630_v63 = vsel %vm622_vm2, %v613_v17, %v629_v56  ;;  %v633_v4 = vsel %vm623_vm3, %v619_v49, 1326507024 }
  0xf8   :  { %v452_v16 = vsub.s32 32, %v451_v0  ;;  %v456_v38 = vsub.s32 4294967266, %v451_v0  ;;  %v453_v20 = vshll.u32 %v2546_v39, %v451_v0  ;;  %v2072_v50 = vmin.u32 %v550_v31, %v2580_v29 }
  0xf9   :  { %vm621_vm5 = vcmp.lt.s32.totalorder %v2564_v36, 2  ;;  %v624_v11 = vsel %vm620_vm0, %v604_v35, %v607_v3  ;;  %v626_v39 = vsel %vm622_vm2, %v610_v15, %v625_v55  ;;  %v571_v56 = vsel %vm486_vm14, %v570_v28, %v546_v45 }
  0xfa   :  { %v454_v25 = vshrl.u32 %v436_v37, %v452_v16  ;;  %v457_v47 = vadd.s32 127, %v456_v38  ;;  %v552_v5 = vclz %v2072_v50  ;;  %v631_v31 = vsel %vm621_vm5, %v628_v61, %v630_v63 }
  0xfb   :  { %v634_v37 = vsel %vm622_vm2, %v616_v41, %v633_v4  ;;  %v2615_v17 = vmul.u32.u64.low %v2560_v30, %v631_v31  ;;  %v2616_v49 = vmul.u32.u64.high %v2560_v30, %v631_v31, %v2615_v17  ;;  %v540_v15 = vadd.s32 %v2526_v52, %v2532_v60 }
  0xfc   :  { %v455_v6 = vor.u32 %v454_v25, %v453_v20  ;;  %v458_v0 = vshll.u32 %v457_v47, 23  ;;  %v2073_v16 = vadd.s32 4294967294, %v552_v5  ;;  %v635_v38 = vsel %vm621_vm5, %v632_v57, %v634_v37 }
  0xfd   :  { %v2621_v3 = vmul.u32.u64.low %v2560_v30, %v635_v38  ;;  %v2622_v35 = vmul.u32.u64.high %v2560_v30, %v635_v38, %v2621_v3  ;;  %v627_v36 = vsel %vm621_vm5, %v624_v11, %v626_v39  ;;  %v2083_v41 = vadd.s32 4294967169, %v800_v10 }
  0xfe   :  { %v459_v50 = vor.u32 4788187, %v458_v0  ;;  %vm2074_vm6 = vcmp.lt.s32.totalorder %v2073_v16, 0  ;;  %v462_v61 = vcvt.s32.f32 %v455_v6  ;;  %v469_v20 = vsel %vm2586_vm1, 0, %v2577_v1 }
  0xff   :  { %v555_v57 = vsel %vm2074_vm6, 0, %v2073_v16  ;;  %v573_v45 = vsel %vm2595_vm4, 0, %v571_v56  ;;  %v646_v28 = vadd.s32 1, %v2616_v49  ;;  %v643_v52 = vmul.u32 %v2560_v30, %v627_v36 }
 0x100   :  { %v460_v55 = vand.u32 2147483647, %v459_v50  ;;  %v556_v25 = vsub.s32 32, %v555_v57  ;;  %v560_v47 = vsub.s32 4294967266, %v555_v57  ;;  %vm645_vm7 = vc.u32 %v2622_v35, %v2615_v17 }
 0x101   :  { %v806_v60 = vadd.s32 1, %v2083_v41  ;;  %v557_v10 = vshll.u32 %v2580_v29, %v555_v57  ;;  %v647_v1 = vsel %vm645_vm7, %v646_v28, %v2616_v49  ;;  %v803_v6 = vand.u32 8388607, %v796_v26 }
 0x102   :  { %v463_v63 = vmul.f32 %v462_v61, %v460_v55  ;;  %v558_v4 = vshrl.u32 %v540_v15, %v556_v25  ;;  %v561_v5 = vadd.s32 127, %v560_v47  ;;  %v648_v39 = vadd.s32 %v647_v1, %v643_v52 }
 0x103   :  { %vm807_vm8 = vcmp.gt.s32.totalorder %v806_v60, 0  ;;  %v473_v0 = vadd.s32 3, %v469_v20  ;;  %v577_v38 = vadd.s32 3, %v573_v45  ;;  %v321_v3 = vadd.f32 %v2551_v18, %v2391_v59 }
 0x104   :  { %v464_v11 = vxor.u32 2147483648, %v463_v63  ;;  %v559_v31 = vor.u32 %v558_v4, %v557_v10  ;;  %v562_v37 = vshll.u32 %v561_v5, 23  ;;  %v808_v16 = vsel %vm807_vm8, %v806_v60, 0 }
 0x105   :  { %v649_v50 = vadd.s32 536870912, %v648_v39  ;;  %v810_v29 = vand.u32 31, %v808_v16  ;;  %v2645_v41 = vand.u32 3, %v473_v0  ;;  %v2647_v20 = vand.u32 3, %v577_v38 }
 0x106   :  { %v465_v30 = vsel %vm382_vm13, %v464_v11, %v463_v63  ;;  %v563_v56 = vor.u32 4788187, %v562_v37  ;;  %v566_v61 = vcvt.s32.f32 %v559_v31  ;;  %vm590_vm9 = vcmp.lt.s32.totalorder %v2460_v12, 0 }
 0x107   :  { %v468_v49 = vsel %vm2586_vm1, %v2444_v58, %v465_v30  ;;  %v650_v15 = vshrl.u32 %v649_v50, 30  ;;  %v811_v36 = vsub.s32 32, %v810_v29  ;;  %v804_v25 = vor.u32 8388608, %v803_v6 }
 0x108   :  { %2210 = vcosq.f32 %v468_v49  ;;  %v564_v55 = vand.u32 2147483647, %v563_v56  ;;  %v2652_v34 = vadd.f32 %v2557_v46, %v2398_v7  ;;  %v2655_v59 = vadd.s32 %v2615_v17, %v2622_v35 }
 0x109   :  { %2212 = vsinq.f32 %v468_v49  ;;  %v651_v57 = vshll.u32 %v650_v15, 30  ;;  %v2657_v18 = vshrl.u32 %v808_v16, 5  ;;  %v344_v45 = vmul.f32 %v2431_v27, %v321_v3 }
 0x10a   :  { %v567_v47 = vmul.f32 %v566_v61, %v564_v55  ;;  %v817_v63 = vshrl.u32 %v2283_v22, %v811_v36  ;;  %v820_v52 = vshrl.u32 %v2284_v51, %v811_v36  ;;  %v823_v60 = vshrl.u32 %v2285_v53, %v811_v36 }
 0x10b   :  { %v2660_v28 = vsub.s32 %v648_v39, %v651_v57  ;;  %v813_v7 = vshll.u32 %v2281_v44, %v810_v29  ;;  %v814_v46 = vshrl.u32 %v2282_v48, %v811_v36  ;;  %v822_v17 = vshll.u32 %v2284_v51, %v810_v29 }
 0x10c   :  { %v568_v10 = vxor.u32 2147483648, %v567_v47  ;;  %v674_v4 = vsub.s32 4, %v650_v15  ;;  %v816_v5 = vshll.u32 %v2282_v48, %v810_v29  ;;  %v819_v1 = vshll.u32 %v2283_v22, %v810_v29 }
 0x10d   :  { %v654_v35 = vsub.s32 0, %v2660_v28  ;;  %vm479_vm10 = vcmp.eq.s32.totalorder %v2645_v41, 2  ;;  %v824_v39 = vor.u32 %v823_v60, %v822_v17  ;;  %v825_v6 = vshll.u32 %v2285_v53, %v810_v29 }
 0x10e   :  { %v569_v11 = vsel %vm486_vm14, %v568_v10, %v567_v47  ;;  %v826_v0 = vshrl.u32 %v2286_v62, %v811_v36  ;;  %vm476_vm11 = vcmp.eq.s32.totalorder %v2645_v41, 0  ;;  %v818_v16 = vor.u32 %v817_v63, %v816_v5 }
 0x10f   :  { %v572_v31 = vsel %vm2595_vm4, %v2447_v23, %v569_v11  ;;  %v2076_v37 = vmin.u32 %v654_v35, %v2660_v28  ;;  %v821_v30 = vor.u32 %v820_v52, %v819_v1  ;;  %vm2044_vm12 = vcmask 293888  }
 0x110   :  { %vm475_vm13 = vcmp.lt.s32.totalorder %v2645_v41, 2  ;;  %2214 = vcosq.f32 %v572_v31  ;;  %v815_v38 = vor.u32 %v814_v46, %v813_v7  ;;  %v827_v50 = vor.u32 %v826_v0, %v825_v6 }
 0x111   :  { %v2682_v49 = vshll.u32 %v804_v25, 8  ;;  %vm472_vm14 = vweird.f32 %v2444_v58  ;;  %2216 = vsinq.f32 %v572_v31  ;;  %v656_v29 = vclz %v2076_v37 }
 0x112   :  { %vm831_vm15 = vcmp.lt.s32.totalorder %v2657_v18, 4  ;;  %v2687_v54 = vadd.f32 %v2438_v24, %v344_v45  ;;  %v2691_v56 = vsel %vm590_vm9, %v674_v4, %v650_v15  ;;  %v812_v3 = vshrl.u32 %v2281_v44, %v811_v36 }
 0x113   :  { %vm828_vm0 = vcmp.lt.s32.totalorder %v2657_v18, 1  ;;  %v837_v55 = vsel %vm831_vm15, %v824_v39, 920167782  ;;  %v3785_v61 = vand.u32 2147483647, %v2460_v12  ;;  %v2077_v25 = vadd.s32 4294967294, %v656_v29 }
 0x114   :  { %vm830_vm2 = vcmp.lt.s32.totalorder %v2657_v18, 3  ;;  %v833_v47 = vsel %vm831_vm15, %v821_v30, 2102212464  ;;  %v840_v45 = vsel %vm828_vm0, %v818_v16, %v821_v30  ;;  %vm829_vm3 = vcmp.lt.s32.totalorder %v2657_v18, 2 }
 0x115   :  { %vm2697_vm1 = vcmp.le.f32.partialorder %v3785_v61, 0.7853982  ;;  %v2211_v63 = vpop.eup %2210  ;;  %v836_v15 = vsel %vm828_vm0, %v815_v38, %v818_v16  ;;  %v838_v52 = vsel %vm830_vm2, %v821_v30, %v837_v55  ;;  %v841_v36 = vsel %vm831_vm15, %v827_v50, 1326507024 }
 0x116   :  { %v2213_v60 = vpop.eup %2212  ;;  %v480_v10 = vxor.u32 2147483648, %v2211_v63  ;;  %vm2078_vm4 = vcmp.lt.s32.totalorder %v2077_v25, 0  ;;  %v832_v7 = vsel %vm828_vm0, %v812_v3, %v815_v38  ;;  %v842_v46 = vsel %vm830_vm2, %v824_v39, %v841_v36 }
 0x117   :  { %v477_v17 = vxor.u32 2147483648, %v2213_v60  ;;  %v659_v35 = vsel %vm2078_vm4, 0, %v2077_v25  ;;  %v834_v4 = vsel %vm830_vm2, %v818_v16, %v833_v47  ;;  %v843_v5 = vsel %vm829_vm3, %v840_v45, %v842_v46 }
 0x118   :  { %v481_v1 = vsel %vm479_vm10, %v480_v10, %v2213_v60  ;;  %v660_v11 = vsub.s32 32, %v659_v35  ;;  %v664_v6 = vsub.s32 4294967266, %v659_v35  ;;  %v839_v0 = vsel %vm829_vm3, %v836_v15, %v838_v52 }
 0x119   :  { %v478_v31 = vsel %vm476_vm11, %v2211_v63, %v477_v17  ;;  %v661_v37 = vshll.u32 %v2660_v28, %v659_v35  ;;  %v2713_v39 = vmul.u32.u64.low %v2682_v49, %v843_v5  ;;  %v2714_v30 = vmul.u32.u64.high %v2682_v49, %v843_v5, %v2713_v39 }
 0x11a   :  { %v482_v16 = vsel %vm475_vm13, %v478_v31, %v481_v1  ;;  %v662_v38 = vshrl.u32 %v2655_v59, %v660_v11  ;;  %v665_v50 = vadd.s32 127, %v664_v6  ;;  %v695_v29 = vand.u32 2139095040, %v2687_v54 }
 0x11b   :  { %v483_v3 = vsel %vm472_vm14, nan, %v482_v16  ;;  %v2723_v55 = vmul.u32.u64.low %v2682_v49, %v839_v0  ;;  %v2724_v61 = vmul.u32.u64.high %v2682_v49, %v839_v0, %v2723_v55  ;;  %v347_v28 = vmul.f32 %v2431_v27, %v2652_v34 }
 0x11c   :  { %2045 = vst.msk [vmem:[%s3779_s4] sm:$0xff] %vm2044_vm12, %v483_v3  ;;  %v663_v41 = vor.u32 %v662_v38, %v661_v37  ;;  %v666_v59 = vshll.u32 %v665_v50, 23  ;;  %v835_v25 = vsel %vm829_vm3, %v832_v7, %v834_v4  ;;  %v696_v58 = vshrl.u32 %v695_v29, 23 }
 0x11d   :  { %vm576_vm5 = vweird.f32 %v2447_v23  ;;  %vm583_vm6 = vcmp.eq.s32.totalorder %v2647_v20, 2  ;;  %v677_v47 = vsel %vm2697_vm1, 0, %v2691_v56  ;;  %v2215_v27 = vpop.eup %2214  ;;  %vm853_vm7 = vc.u32 %v2714_v30, %v2723_v55 }
 0x11e   :  { %v667_v34 = vor.u32 4788187, %v666_v59  ;;  %v692_v45 = vand.u32 2147483647, %v2687_v54  ;;  %v2079_v63 = vadd.s32 4294967169, %v696_v58  ;;  %v2217_v15 = vpop.eup %2216  ;;  %v584_v18 = vxor.u32 2147483648, %v2215_v27 }
 0x11f   :  { %v851_v52 = vmul.u32 %v2682_v49, %v835_v25  ;;  %v854_v36 = vadd.s32 1, %v2724_v61  ;;  %v2746_v60 = vadd.f32 %v2438_v24, %v347_v28  ;;  %v581_v10 = vxor.u32 2147483648, %v2217_v15 }
 0x120   :  { %v668_v7 = vand.u32 2147483647, %v667_v34  ;;  %v670_v56 = vcvt.s32.f32 %v663_v41  ;;  %v702_v46 = vadd.s32 1, %v2079_v63  ;;  %vm579_vm8 = vcmp.lt.s32.totalorder %v2647_v20, 2 }
 0x121   :  { %vm580_vm10 = vcmp.eq.s32.totalorder %v2647_v20, 0  ;;  %v585_v17 = vsel %vm583_vm6, %v584_v18, %v2217_v15  ;;  %v855_v35 = vsel %vm853_vm7, %v854_v36, %v2724_v61  ;;  %v681_v24 = vadd.s32 3, %v677_v47 }
 0x122   :  { %v582_v4 = vsel %vm580_vm10, %v2215_v27, %v581_v10  ;;  %v671_v49 = vmul.f32 %v670_v56, %v668_v7  ;;  %v856_v5 = vadd.s32 %v855_v35, %v851_v52  ;;  %vm703_vm11 = vcmp.gt.s32.totalorder %v702_v46, 0 }
 0x123   :  { %v586_v1 = vsel %vm579_vm8, %v582_v4, %v585_v17  ;;  %v699_v11 = vand.u32 8388607, %v692_v45  ;;  %v704_v6 = vsel %vm703_vm11, %v702_v46, 0  ;;  %v1007_v20 = vand.u32 2139095040, %v2746_v60 }
 0x124   :  { %v587_v0 = vsel %vm576_vm5, nan, %v586_v1  ;;  %v672_v31 = vxor.u32 2147483648, %v671_v49  ;;  %v857_v37 = vadd.s32 536870912, %v856_v5  ;;  %v706_v39 = vand.u32 31, %v704_v6 }
 0x125   :  { %2046 = vst.msk [vmem:[%s3779_s4 + $0x8] sm:$0xff] %vm2044_vm12, %v587_v0  ;;  %v2769_v50 = vand.u32 3, %v681_v24  ;;  %v700_v29 = vor.u32 8388608, %v699_v11  ;;  %v1008_v41 = vshrl.u32 %v1007_v20, 23  ;;  %v705_v57 = vshrl.u32 %v704_v6, 5 }
 0x126   :  { %v673_v16 = vsel %vm590_vm9, %v672_v31, %v671_v49  ;;  %v2764_v38 = vshrl.u32 %v857_v37, 30  ;;  %v707_v3 = vsub.s32 32, %v706_v39  ;;  %v709_v28 = vshll.u32 %v2281_v44, %v706_v39 }
 0x127   :  { %v676_v23 = vsel %vm2697_vm1, %v2460_v12, %v673_v16  ;;  %v712_v25 = vshll.u32 %v2282_v48, %v706_v39  ;;  %v715_v27 = vshll.u32 %v2283_v22, %v706_v39  ;;  %v718_v18 = vshll.u32 %v2284_v51, %v706_v39 }
 0x128   :  { %2218 = vcosq.f32 %v676_v23  ;;  %v859_v61 = vshll.u32 %v2764_v38, 30  ;;  %v710_v59 = vshrl.u32 %v2282_v48, %v707_v3  ;;  %v713_v58 = vshrl.u32 %v2283_v22, %v707_v3 }
 0x129   :  { %2220 = vsinq.f32 %v676_v23  ;;  %v716_v34 = vshrl.u32 %v2284_v51, %v707_v3  ;;  %v719_v52 = vshrl.u32 %v2285_v53, %v707_v3  ;;  %v2783_v7 = vshll.u32 %v700_v29, 8 }
 0x12a   :  { %v2776_v47 = vsub.s32 %v856_v5, %v859_v61  ;;  %v711_v63 = vor.u32 %v710_v59, %v709_v28  ;;  %v714_v15 = vor.u32 %v713_v58, %v712_v25  ;;  %v721_v46 = vshll.u32 %v2285_v53, %v706_v39  ;;  %v256_v61 = vpop.permute.xlu1 %255 }
 0x12b   :  { %v717_v10 = vor.u32 %v716_v34, %v715_v27  ;;  %v720_v56 = vor.u32 %v719_v52, %v718_v18  ;;  %v722_v17 = vshrl.u32 %v2286_v62, %v707_v3  ;;  %v2091_v35 = vadd.s32 4294967169, %v1008_v41 }
 0x12c   :  { %v862_v36 = vsub.s32 0, %v2776_v47  ;;  %v708_v49 = vshrl.u32 %v2281_v44, %v707_v3  ;;  %vm724_vm9 = vcmp.lt.s32.totalorder %v705_v57, 1  ;;  %vm727_vm13 = vcmp.lt.s32.totalorder %v705_v57, 4 }
 0x12d   :  { %vm687_vm14 = vcmp.eq.s32.totalorder %v2769_v50, 2  ;;  %v723_v5 = vor.u32 %v722_v17, %v721_v46  ;;  %v729_v1 = vsel %vm727_vm13, %v717_v10, 2102212464  ;;  %v732_v24 = vsel %vm724_vm9, %v711_v63, %v714_v15 }
 0x12e   :  { %v2084_v4 = vmin.u32 %v862_v36, %v2776_v47  ;;  %v733_v11 = vsel %vm727_vm13, %v720_v56, 920167782  ;;  %vm684_vm15 = vcmp.eq.s32.totalorder %v2769_v50, 0  ;;  %vm725_vm0 = vcmp.lt.s32.totalorder %v705_v57, 2 }
 0x12f   :  { %vm726_vm1 = vcmp.lt.s32.totalorder %v705_v57, 3  ;;  %v1004_v0 = vand.u32 2147483647, %v2746_v60  ;;  %vm683_vm2 = vcmp.lt.s32.totalorder %v2769_v50, 2  ;;  %v728_v31 = vsel %vm724_vm9, %v708_v49, %v711_v63 }
 0x130   :  { %v864_v6 = vclz %v2084_v4  ;;  %v734_v37 = vsel %vm726_vm1, %v717_v10, %v733_v11  ;;  %v736_v20 = vsel %vm724_vm9, %v714_v15, %v717_v10  ;;  %v737_v39 = vsel %vm727_vm13, %v723_v5, 1326507024 }
 0x131   :  { %vm680_vm3 = vweird.f32 %v2460_v12  ;;  %v730_v23 = vsel %vm726_vm1, %v714_v15, %v729_v1  ;;  %v735_v29 = vsel %vm725_vm0, %v732_v24, %v734_v37  ;;  %v738_v3 = vsel %vm726_vm1, %v720_v56, %v737_v39 }
 0x132   :  { %v2085_v16 = vadd.s32 4294967294, %v864_v6  ;;  %vm798_vm4 = vcmp.lt.s32.totalorder %v2541_v9, 0  ;;  %v739_v28 = vsel %vm725_vm0, %v736_v20, %v738_v3  ;;  %v1014_v25 = vadd.s32 1, %v2091_v35 }
 0x133   :  { %v2798_v41 = vmul.u32.u64.low %v2783_v7, %v735_v29  ;;  %v2799_v59 = vmul.u32.u64.high %v2783_v7, %v735_v29, %v2798_v41  ;;  %v852_v58 = vadd.s32 %v2723_v55, %v2714_v30  ;;  %v1011_v18 = vand.u32 8388607, %v1004_v0 }
 0x134   :  { %vm2086_vm5 = vcmp.lt.s32.totalorder %v2085_v16, 0  ;;  %v2805_v27 = vmul.u32.u64.low %v2783_v7, %v739_v28  ;;  %v2806_v34 = vmul.u32.u64.high %v2783_v7, %v739_v28, %v2805_v27  ;;  %vm1015_vm6 = vcmp.gt.s32.totalorder %v1014_v25, 0 }
 0x135   :  { %v2219_v63 = vpop.eup %2218  ;;  %v867_v15 = vsel %vm2086_vm5, 0, %v2085_v16  ;;  %v307_v52 = vmul.f32 %v2416_v40, %v256_v61  ;;  %v731_v17 = vsel %vm725_vm0, %v728_v31, %v730_v23  ;;  %v882_v55 = vsub.s32 4, %v2764_v38 }
 0x136   :  { %v2221_v36 = vpop.eup %2220  ;;  %v688_v10 = vxor.u32 2147483648, %v2219_v63  ;;  %v868_v56 = vsub.s32 32, %v867_v15  ;;  %v872_v46 = vsub.s32 4294967266, %v867_v15  ;;  %v750_v35 = vadd.s32 1, %v2799_v59 }
 0x137   :  { %v685_v30 = vxor.u32 2147483648, %v2221_v36  ;;  %v1016_v4 = vsel %vm1015_vm6, %v1014_v25, 0  ;;  %v869_v5 = vshll.u32 %v2776_v47, %v867_v15  ;;  %v747_v6 = vmul.u32 %v2783_v7, %v731_v17 }
 0x138   :  { %v689_v49 = vsel %vm687_vm14, %v688_v10, %v2221_v36  ;;  %v870_v1 = vshrl.u32 %v852_v58, %v868_v56  ;;  %v873_v24 = vadd.s32 127, %v872_v46  ;;  %vm749_vm7 = vc.u32 %v2806_v34, %v2798_v41 }
 0x139   :  { %v686_v11 = vsel %vm684_vm15, %v2219_v63, %v685_v30  ;;  %v1018_v57 = vand.u32 31, %v1016_v4  ;;  %v751_v39 = vsel %vm749_vm7, %v750_v35, %v2799_v59  ;;  %vm2829_vm8 = vcmp.le.f32.partialorder %v796_v26, 0.7853982 }
 0x13a   :  { %v690_v31 = vsel %vm683_vm2, %v686_v11, %v689_v49  ;;  %v871_v37 = vor.u32 %v870_v1, %v869_v5  ;;  %v874_v20 = vshll.u32 %v873_v24, 23  ;;  %v752_v7 = vadd.s32 %v751_v39, %v747_v6  ;;  %v2861_v6 = vld [vmem:[%s3777_s2] ss:$0 sm:$0xff] }
 0x13b   :  { %v691_v47 = vsel %vm680_vm3, nan, %v690_v31  ;;  %v1019_v23 = vsub.s32 32, %v1018_v57  ;;  %v883_v29 = vsel %vm798_vm4, %v882_v55, %v2764_v38  ;;  %v1012_v12 = vor.u32 8388608, %v1011_v18 }
 0x13c   :  { %2047 = vst.msk [vmem:[%s3779_s4 + $0x10] sm:$0xff] %vm2044_vm12, %v691_v47  ;;  %v875_v50 = vor.u32 4788187, %v874_v20  ;;  %v323_v3 = vadd.f32 %v307_v52, %v2396_v2  ;;  %v753_v61 = vadd.s32 536870912, %v752_v7  ;;  %v2841_v26 = vshrl.u32 %v1016_v4, 5 }
 0x13d   :  { %v1022_v28 = vshrl.u32 %v2282_v48, %v1019_v23  ;;  %v1025_v59 = vshrl.u32 %v2283_v22, %v1019_v23  ;;  %v878_v58 = vcvt.s32.f32 %v871_v37  ;;  %v1028_v27 = vshrl.u32 %v2284_v51, %v1019_v23 }
 0x13e   :  { %v876_v25 = vand.u32 2147483647, %v875_v50  ;;  %v1031_v63 = vshrl.u32 %v2285_v53, %v1019_v23  ;;  %v754_v15 = vshrl.u32 %v753_v61, 30  ;;  %v1021_v36 = vshll.u32 %v2281_v44, %v1018_v57 }
 0x13f   :  { %v1024_v38 = vshll.u32 %v2282_v48, %v1018_v57  ;;  %v1027_v2 = vshll.u32 %v2283_v22, %v1018_v57  ;;  %v1030_v52 = vshll.u32 %v2284_v51, %v1018_v57  ;;  %v1033_v10 = vshll.u32 %v2285_v53, %v1018_v57 }
 0x140   :  { %v879_v18 = vmul.f32 %v878_v58, %v876_v25  ;;  %v1034_v56 = vshrl.u32 %v2286_v62, %v1019_v23  ;;  %v885_v46 = vsel %vm2829_vm8, 0, %v883_v29  ;;  %v755_v17 = vshll.u32 %v754_v15, 30 }
 0x141   :  { %v1023_v30 = vor.u32 %v1022_v28, %v1021_v36  ;;  %v1026_v55 = vor.u32 %v1025_v59, %v1024_v38  ;;  %v1029_v4 = vor.u32 %v1028_v27, %v1027_v2  ;;  %v1032_v49 = vor.u32 %v1031_v63, %v1030_v52  ;;  %v2888_v28 = vld [vmem:[%s3778_s3] ss:$0 sm:$0xff] }
 0x142   :  { %v880_v35 = vxor.u32 2147483648, %v879_v18  ;;  %v1035_v5 = vor.u32 %v1034_v56, %v1033_v10  ;;  %v2855_v1 = vsub.s32 %v752_v7, %v755_v17  ;;  %v1020_v24 = vshrl.u32 %v2281_v44, %v1019_v23 }
 0x143   :  { %v1052_v11 = vshll.u32 %v1012_v12, 8  ;;  %v346_v57 = vmul.f32 %v2861_v6, %v323_v3  ;;  %vm1036_vm10 = vcmp.lt.s32.totalorder %v2841_v26, 1  ;;  %vm1037_vm11 = vcmp.lt.s32.totalorder %v2841_v26, 2 }
 0x144   :  { %v881_v31 = vsel %vm798_vm4, %v880_v35, %v879_v18  ;;  %vm1038_vm9 = vcmp.lt.s32.totalorder %v2841_v26, 3  ;;  %v758_v20 = vsub.s32 0, %v2855_v1  ;;  %vm1039_vm13 = vcmp.lt.s32.totalorder %v2841_v26, 4 }
 0x145   :  { %v884_v37 = vsel %vm2829_vm8, %v2541_v9, %v881_v31  ;;  %v1044_v39 = vsel %vm1036_vm10, %v1023_v30, %v1026_v55  ;;  %v1041_v47 = vsel %vm1039_vm13, %v1029_v4, 2102212464  ;;  %v1045_v7 = vsel %vm1039_vm13, %v1032_v49, 920167782 }
 0x146   :  { %2222 = vcosq.f32 %v884_v37  ;;  %v1049_v23 = vsel %vm1039_vm13, %v1035_v5, 1326507024  ;;  %v2080_v50 = vmin.u32 %v758_v20, %v2855_v1  ;;  %v1046_v29 = vsel %vm1038_vm9, %v1029_v4, %v1045_v7 }
 0x147   :  { %2224 = vsinq.f32 %v884_v37  ;;  %v1048_v16 = vsel %vm1036_vm10, %v1026_v55, %v1029_v4  ;;  %v778_v12 = vsub.s32 4, %v754_v15  ;;  %v1047_v3 = vsel %vm1037_vm11, %v1044_v39, %v1046_v29 }
 0x148   :  { %v1050_v61 = vsel %vm1038_vm9, %v1032_v49, %v1049_v23  ;;  %v2891_v59 = vadd.f32 %v2888_v28, %v346_v57  ;;  %v889_v25 = vadd.s32 3, %v885_v46  ;;  %v760_v58 = vclz %v2080_v50  ;;  %v268_v57 = vpop.permute.xlu0 %267 }
 0x149   :  { %v1040_v27 = vsel %vm1036_vm10, %v1020_v24, %v1023_v30  ;;  %v1042_v63 = vsel %vm1038_vm9, %v1026_v55, %v1041_v47  ;;  %v1051_v36 = vsel %vm1037_vm11, %v1048_v16, %v1050_v61  ;;  %vm694_vm14 = vcmp.lt.s32.totalorder %v2687_v54, 0 }
 0x14a   :  { %v2899_v38 = vmul.u32.u64.low %v1052_v11, %v1047_v3  ;;  %v2900_v2 = vmul.u32.u64.high %v1052_v11, %v1047_v3, %v2899_v38  ;;  %v2081_v18 = vadd.s32 4294967294, %v760_v58  ;;  %v779_v56 = vsel %vm694_vm14, %v778_v12, %v754_v15 }
 0x14b   :  { %v2904_v52 = vmul.u32.u64.low %v1052_v11, %v1051_v36  ;;  %v2905_v10 = vmul.u32.u64.high %v1052_v11, %v1051_v36, %v2904_v52  ;;  %v903_v46 = vand.u32 2139095040, %v2891_v59  ;;  %vm2912_vm15 = vcmp.le.f32.partialorder %v692_v45, 0.7853982 }
 0x14c   :  { %vm2082_vm0 = vcmp.lt.s32.totalorder %v2081_v18, 0  ;;  %v1043_v30 = vsel %vm1037_vm11, %v1040_v27, %v1042_v63  ;;  %v890_v55 = vand.u32 3, %v889_v25  ;;  %v1062_v4 = vadd.s32 1, %v2900_v2  ;;  %v264_v52 = vpop.permute.xlu1 %263 }
 0x14d   :  { %v763_v35 = vsel %vm2082_vm0, 0, %v2081_v18  ;;  %v904_v49 = vshrl.u32 %v903_v46, 23  ;;  %v748_v15 = vadd.s32 %v2798_v41, %v2806_v34  ;;  %v781_v45 = vsel %vm2912_vm15, 0, %v779_v56 }
 0x14e   :  { %v764_v5 = vsub.s32 32, %v763_v35  ;;  %v768_v24 = vsub.s32 4294967266, %v763_v35  ;;  %v1059_v31 = vmul.u32 %v1052_v11, %v1043_v30  ;;  %vm1061_vm1 = vc.u32 %v2905_v10, %v2899_v38 }
 0x14f   :  { %v900_v26 = vand.u32 2147483647, %v2891_v59  ;;  %v2087_v37 = vadd.s32 4294967169, %v904_v49  ;;  %v765_v20 = vshll.u32 %v2855_v1, %v763_v35  ;;  %v1063_v7 = vsel %vm1061_vm1, %v1062_v4, %v2900_v2 }
 0x150   :  { %v766_v39 = vshrl.u32 %v748_v15, %v764_v5  ;;  %v769_v47 = vadd.s32 127, %v768_v24  ;;  %vm888_vm2 = vweird.f32 %v2541_v9  ;;  %v1064_v41 = vadd.s32 %v1063_v7, %v1059_v31 }
 0x151   :  { %v910_v34 = vadd.s32 1, %v2087_v37  ;;  %v310_v23 = vmul.f32 %v2416_v40, %v268_v57  ;;  %vm892_vm3 = vcmp.eq.s32.totalorder %v890_v55, 0  ;;  %vm895_vm4 = vcmp.eq.s32.totalorder %v890_v55, 2 }
 0x152   :  { %v767_v11 = vor.u32 %v766_v39, %v765_v20  ;;  %v770_v29 = vshll.u32 %v769_v47, 23  ;;  %v785_v3 = vadd.s32 3, %v781_v45  ;;  %v1065_v61 = vadd.s32 536870912, %v1064_v41 }
 0x153   :  { %v2223_v50 = vpop.eup %2222  ;;  %vm911_vm5 = vcmp.gt.s32.totalorder %v910_v34, 0  ;;  %v907_v58 = vand.u32 8388607, %v900_v26  ;;  %v326_v18 = vadd.f32 %v310_v23, %v2402_v13  ;;  %vm891_vm6 = vcmp.lt.s32.totalorder %v890_v55, 2 }
 0x154   :  { %v2225_v16 = vpop.eup %2224  ;;  %v896_v12 = vxor.u32 2147483648, %v2223_v50  ;;  %v771_v25 = vor.u32 4788187, %v770_v29  ;;  %v912_v27 = vsel %vm911_vm5, %v910_v34, 0  ;;  %v2932_v36 = vshrl.u32 %v1065_v61, 30 }
 0x155   :  { %v893_v1 = vxor.u32 2147483648, %v2225_v16  ;;  %v914_v2 = vand.u32 31, %v912_v27  ;;  %v774_v30 = vcvt.s32.f32 %v767_v11  ;;  %v2936_v4 = vand.u32 3, %v785_v3 }
 0x156   :  { %v897_v63 = vsel %vm895_vm4, %v896_v12, %v2225_v16  ;;  %v772_v46 = vand.u32 2147483647, %v771_v25  ;;  %v1067_v49 = vshll.u32 %v2932_v36, 30  ;;  %v908_v45 = vor.u32 8388608, %v907_v58 }
 0x157   :  { %v894_v56 = vsel %vm892_vm3, %v2223_v50, %v893_v1  ;;  %v915_v15 = vsub.s32 32, %v914_v2  ;;  %v309_v57 = vmul.f32 %v2416_v40, %v264_v52  ;;  %v1060_v13 = vadd.s32 %v2899_v38, %v2905_v10 }
 0x158   :  { %v898_v35 = vsel %vm891_vm6, %v894_v56, %v897_v63  ;;  %v775_v24 = vmul.f32 %v774_v30, %v772_v46  ;;  %v2948_v55 = vsub.s32 %v1064_v41, %v1067_v49  ;;  %v349_v37 = vmul.f32 %v2861_v6, %v326_v18 }
 0x159   :  { %v899_v5 = vsel %vm888_vm2, nan, %v898_v35  ;;  %v918_v31 = vshrl.u32 %v2282_v48, %v915_v15  ;;  %v913_v20 = vshrl.u32 %v912_v27, 5  ;;  %v917_v39 = vshll.u32 %v2281_v44, %v914_v2 }
 0x15a   :  { %2049 = vst.msk [vmem:[%s3779_s4 + $0x20] sm:$0xff] %vm2044_vm12, %v899_v5  ;;  %v776_v9 = vxor.u32 2147483648, %v775_v24  ;;  %v921_v47 = vshrl.u32 %v2283_v22, %v915_v15  ;;  %v1070_v7 = vsub.s32 0, %v2948_v55  ;;  %v920_v34 = vshll.u32 %v2282_v48, %v914_v2 }
 0x15b   :  { %v923_v23 = vshll.u32 %v2283_v22, %v914_v2  ;;  %v924_v38 = vshrl.u32 %v2284_v51, %v915_v15  ;;  %v919_v41 = vor.u32 %v918_v31, %v917_v39  ;;  %v926_v50 = vshll.u32 %v2284_v51, %v914_v2 }
 0x15c   :  { %v777_v10 = vsel %vm694_vm14, %v776_v9, %v775_v24  ;;  %v927_v11 = vshrl.u32 %v2285_v53, %v915_v15  ;;  %v2092_v16 = vmin.u32 %v1070_v7, %v2948_v55  ;;  %v922_v12 = vor.u32 %v921_v47, %v920_v34 }
 0x15d   :  { %v780_v29 = vsel %vm2912_vm15, %v2687_v54, %v777_v10  ;;  %v925_v3 = vor.u32 %v924_v38, %v923_v23  ;;  %v929_v1 = vshll.u32 %v2285_v53, %v914_v2  ;;  %v930_v25 = vshrl.u32 %v2286_v62, %v915_v15 }
 0x15e   :  { %2226 = vcosq.f32 %v780_v29  ;;  %v928_v61 = vor.u32 %v927_v11, %v926_v50  ;;  %vm1006_vm7 = vcmp.lt.s32.totalorder %v2746_v60, 0  ;;  %v1072_v58 = vclz %v2092_v16 }
 0x15f   :  { %2228 = vsinq.f32 %v780_v29  ;;  %v948_v27 = vshll.u32 %v908_v45, 8  ;;  %v325_v63 = vadd.f32 %v309_v57, %v2400_v8  ;;  %v1090_v17 = vsub.s32 4, %v2932_v36 }
 0x160   :  { %v916_v18 = vshrl.u32 %v2281_v44, %v915_v15  ;;  %v931_v52 = vor.u32 %v930_v25, %v929_v1  ;;  %v2973_v56 = vadd.f32 %v2888_v28, %v349_v37  ;;  %v2093_v46 = vadd.s32 4294967294, %v1072_v58 }
 0x161   :  { %vm932_vm8 = vcmp.lt.s32.totalorder %v913_v20, 1  ;;  %vm934_vm10 = vcmp.lt.s32.totalorder %v913_v20, 3  ;;  %vm935_vm11 = vcmp.lt.s32.totalorder %v913_v20, 4  ;;  %vm933_vm13 = vcmp.lt.s32.totalorder %v913_v20, 2 }
 0x162   :  { %v937_v2 = vsel %vm935_vm11, %v925_v3, 2102212464  ;;  %v940_v30 = vsel %vm932_vm8, %v919_v41, %v922_v12  ;;  %v941_v35 = vsel %vm935_vm11, %v928_v61, 920167782  ;;  %v944_v49 = vsel %vm932_vm8, %v922_v12, %v925_v3 }
 0x163   :  { %vm2094_vm9 = vcmp.lt.s32.totalorder %v2093_v46, 0  ;;  %v942_v8 = vsel %vm934_vm10, %v925_v3, %v941_v35  ;;  %v945_v5 = vsel %vm935_vm11, %v931_v52, 1326507024  ;;  %v936_v45 = vsel %vm932_vm8, %v916_v18, %v919_v41 }
 0x164   :  { %v1075_v24 = vsel %vm2094_vm9, 0, %v2093_v46  ;;  %v943_v15 = vsel %vm933_vm13, %v940_v30, %v942_v8  ;;  %v946_v57 = vsel %vm934_vm10, %v928_v61, %v945_v5  ;;  %v938_v9 = vsel %vm934_vm10, %v922_v12, %v937_v2 }
 0x165   :  { %v1076_v31 = vsub.s32 32, %v1075_v24  ;;  %v1080_v37 = vsub.s32 4294967266, %v1075_v24  ;;  %v947_v39 = vsel %vm933_vm13, %v944_v49, %v946_v57  ;;  %v1077_v38 = vshll.u32 %v2948_v55, %v1075_v24 }
 0x166   :  { %v2980_v47 = vmul.u32.u64.low %v948_v27, %v947_v39  ;;  %v2981_v7 = vmul.u32.u64.high %v948_v27, %v947_v39, %v2980_v47  ;;  %v2983_v34 = vmul.u32.u64.low %v948_v27, %v943_v15  ;;  %v2984_v23 = vmul.u32.u64.high %v948_v27, %v943_v15, %v2983_v34 }
 0x167   :  { %v1078_v10 = vshrl.u32 %v1060_v13, %v1076_v31  ;;  %v1081_v41 = vadd.s32 127, %v1080_v37  ;;  %v1215_v50 = vand.u32 2139095040, %v2973_v56  ;;  %vm2990_vm14 = vcmp.le.f32.partialorder %v1004_v0, 0.7853982 }
 0x168   :  { %v1091_v29 = vsel %vm1006_vm7, %v1090_v17, %v2932_v36  ;;  %v939_v16 = vsel %vm933_vm13, %v936_v45, %v938_v9  ;;  %v348_v12 = vmul.f32 %v2861_v6, %v325_v63  ;;  %vm787_vm15 = vcmp.lt.s32.totalorder %v2936_v4, 2  ;;  %v276_v63 = vpop.permute.xlu0 %275 }
 0x169   :  { %v1079_v13 = vor.u32 %v1078_v10, %v1077_v38  ;;  %v1082_v55 = vshll.u32 %v1081_v41, 23  ;;  %v1216_v3 = vshrl.u32 %v1215_v50, 23  ;;  %vm791_vm0 = vcmp.eq.s32.totalorder %v2936_v4, 2 }
 0x16a   :  { %vm957_vm1 = vc.u32 %v2981_v7, %v2983_v34  ;;  %v958_v0 = vadd.s32 1, %v2984_v23  ;;  %v1212_v61 = vand.u32 2147483647, %v2973_v56  ;;  %v1093_v36 = vsel %vm2990_vm14, 0, %v1091_v29 }
 0x16b   :  { %v2227_v1 = vpop.eup %2226  ;;  %v1083_v25 = vor.u32 4788187, %v1082_v55  ;;  %v955_v20 = vmul.u32 %v948_v27, %v939_v16  ;;  %v2099_v58 = vadd.s32 4294967169, %v1216_v3  ;;  %v1086_v52 = vcvt.s32.f32 %v1079_v13 }
 0x16c   :  { %v2229_v17 = vpop.eup %2228  ;;  %v792_v18 = vxor.u32 2147483648, %v2227_v1  ;;  %v959_v46 = vsel %vm957_vm1, %v958_v0, %v2984_v23  ;;  %v3008_v2 = vadd.f32 %v2888_v28, %v348_v12  ;;  %vm788_vm2 = vcmp.eq.s32.totalorder %v2936_v4, 0 }
 0x16d   :  { %v789_v30 = vxor.u32 2147483648, %v2229_v17  ;;  %v1084_v35 = vand.u32 2147483647, %v1083_v25  ;;  %v960_v49 = vadd.s32 %v959_v46, %v955_v20  ;;  %v1222_v8 = vadd.s32 1, %v2099_v58 }
 0x16e   :  { %v793_v5 = vsel %vm791_vm0, %v792_v18, %v2229_v17  ;;  %v1097_v27 = vadd.s32 3, %v1093_v36  ;;  %v312_v24 = vmul.f32 %v2416_v40, %v276_v63  ;;  %vm784_vm4 = vweird.f32 %v2687_v54 }
 0x16f   :  { %v790_v45 = vsel %vm788_vm2, %v2227_v1, %v789_v30  ;;  %v1087_v15 = vmul.f32 %v1086_v52, %v1084_v35  ;;  %v961_v57 = vadd.s32 536870912, %v960_v49  ;;  %vm1223_vm3 = vcmp.gt.s32.totalorder %v1222_v8, 0 }
 0x170   :  { %v794_v31 = vsel %vm787_vm15, %v790_v45, %v793_v5  ;;  %v1219_v37 = vand.u32 8388607, %v1212_v61  ;;  %v1224_v9 = vsel %vm1223_vm3, %v1222_v8, 0  ;;  %v1111_v38 = vand.u32 2139095040, %v3008_v2 }
 0x171   :  { %v795_v39 = vsel %vm784_vm4, nan, %v794_v31  ;;  %v1088_v47 = vxor.u32 2147483648, %v1087_v15  ;;  %v3019_v23 = vshrl.u32 %v961_v57, 30  ;;  %v1226_v10 = vand.u32 31, %v1224_v9 }
 0x172   :  { %2048 = vst.msk [vmem:[%s3779_s4 + $0x18] sm:$0xff] %vm2044_vm12, %v795_v39  ;;  %v3028_v4 = vand.u32 3, %v1097_v27  ;;  %v3032_v50 = vadd.f32 %v312_v24, %v2406_v19  ;;  %v3038_v16 = vadd.s32 %v2983_v34, %v2981_v7  ;;  %v1220_v12 = vor.u32 8388608, %v1219_v37 }
 0x173   :  { %v1089_v54 = vsel %vm1006_vm7, %v1088_v47, %v1087_v15  ;;  %v963_v41 = vshll.u32 %v3019_v23, 30  ;;  %v1227_v13 = vsub.s32 32, %v1226_v10  ;;  %v1225_v3 = vshrl.u32 %v1224_v9, 5 }
 0x174   :  { %v1092_v29 = vsel %vm2990_vm14, %v2746_v60, %v1089_v54  ;;  %v1112_v0 = vshrl.u32 %v1111_v38, 23  ;;  %v1229_v1 = vshll.u32 %v2281_v44, %v1226_v10  ;;  %v1232_v25 = vshll.u32 %v2282_v48, %v1226_v10 }
 0x175   :  { %2230 = vcosq.f32 %v1092_v29  ;;  %v3040_v55 = vsub.s32 %v960_v49, %v963_v41  ;;  %v1230_v19 = vshrl.u32 %v2282_v48, %v1227_v13  ;;  %v1233_v36 = vshrl.u32 %v2283_v22, %v1227_v13 }
 0x176   :  { %2232 = vsinq.f32 %v1092_v29  ;;  %v1235_v7 = vshll.u32 %v2283_v22, %v1226_v10  ;;  %v1236_v34 = vshrl.u32 %v2284_v51, %v1227_v13  ;;  %v1238_v58 = vshll.u32 %v2284_v51, %v1226_v10 }
 0x177   :  { %v966_v11 = vsub.s32 0, %v3040_v55  ;;  %v1231_v20 = vor.u32 %v1230_v19, %v1229_v1  ;;  %v1239_v63 = vshrl.u32 %v2285_v53, %v1227_v13  ;;  %v3051_v17 = vshll.u32 %v1220_v12, 8 }
 0x178   :  { %v1234_v52 = vor.u32 %v1233_v36, %v1232_v25  ;;  %v1237_v46 = vor.u32 %v1236_v34, %v1235_v7  ;;  %v2095_v30 = vadd.s32 4294967169, %v1112_v0  ;;  %v1228_v35 = vshrl.u32 %v2281_v44, %v1227_v13 }
 0x179   :  { %v2088_v18 = vmin.u32 %v966_v11, %v3040_v55  ;;  %v1240_v49 = vor.u32 %v1239_v63, %v1238_v58  ;;  %v1241_v8 = vshll.u32 %v2285_v53, %v1226_v10  ;;  %v1242_v5 = vshrl.u32 %v2286_v62, %v1227_v13 }
 0x17a   :  { %vm1244_vm5 = vcmp.lt.s32.totalorder %v1225_v3, 1  ;;  %vm1245_vm6 = vcmp.lt.s32.totalorder %v1225_v3, 2  ;;  %vm1246_vm7 = vcmp.lt.s32.totalorder %v1225_v3, 3  ;;  %vm1103_vm8 = vcmp.eq.s32.totalorder %v3028_v4, 2 }
 0x17b   :  { %v968_v27 = vclz %v2088_v18  ;;  %vm902_vm10 = vcmp.lt.s32.totalorder %v2891_v59, 0  ;;  %v1243_v24 = vor.u32 %v1242_v5, %v1241_v8  ;;  %vm1247_vm11 = vcmp.lt.s32.totalorder %v1225_v3, 4 }
 0x17c   :  { %v1248_v45 = vsel %vm1244_vm5, %v1228_v35, %v1231_v20  ;;  %v1252_v15 = vsel %vm1244_vm5, %v1231_v20, %v1234_v52  ;;  %vm1100_vm9 = vcmp.eq.s32.totalorder %v3028_v4, 0  ;;  %v1249_v31 = vsel %vm1247_vm11, %v1237_v46, 2102212464 }
 0x17d   :  { %v2089_v57 = vadd.s32 4294967294, %v968_v27  ;;  %v1253_v37 = vsel %vm1247_vm11, %v1240_v49, 920167782  ;;  %v1256_v9 = vsel %vm1244_vm5, %v1234_v52, %v1237_v46  ;;  %vm1099_vm13 = vcmp.lt.s32.totalorder %v3028_v4, 2 }
 0x17e   :  { %v1250_v39 = vsel %vm1246_vm7, %v1234_v52, %v1249_v31  ;;  %v1254_v47 = vsel %vm1246_vm7, %v1237_v46, %v1253_v37  ;;  %v1257_v38 = vsel %vm1247_vm11, %v1243_v24, 1326507024  ;;  %v1118_v10 = vadd.s32 1, %v2095_v30 }
 0x17f   :  { %vm1096_vm14 = vweird.f32 %v2746_v60  ;;  %vm3066_vm15 = vcmp.le.f32.partialorder %v900_v26, 0.7853982  ;;  %vm2090_vm0 = vcmp.lt.s32.totalorder %v2089_v57, 0  ;;  %v1255_v41 = vsel %vm1245_vm6, %v1252_v15, %v1254_v47 }
 0x180   :  { %v1258_v29 = vsel %vm1246_vm7, %v1240_v49, %v1257_v38  ;;  %v1108_v12 = vand.u32 2147483647, %v3008_v2  ;;  %v971_v13 = vsel %vm2090_vm0, 0, %v2089_v57  ;;  %v986_v11 = vsub.s32 4, %v3019_v23 }
 0x181   :  { %v1259_v0 = vsel %vm1245_vm6, %v1256_v9, %v1258_v29  ;;  %v3075_v1 = vmul.u32.u64.low %v3051_v17, %v1255_v41  ;;  %v3076_v19 = vmul.u32.u64.high %v3051_v17, %v1255_v41, %v3075_v1  ;;  %v972_v25 = vsub.s32 32, %v971_v13 }
 0x182   :  { %v976_v26 = vsub.s32 4294967266, %v971_v13  ;;  %v1251_v36 = vsel %vm1245_vm6, %v1248_v45, %v1250_v39  ;;  %v2231_v7 = vpop.eup %2230  ;;  %v973_v34 = vshll.u32 %v3040_v55, %v971_v13  ;;  %vm1119_vm1 = vcmp.gt.s32.totalorder %v1118_v10, 0 }
 0x183   :  { %v3083_v20 = vmul.u32.u64.low %v3051_v17, %v1259_v0  ;;  %v3084_v58 = vmul.u32.u64.high %v3051_v17, %v1259_v0, %v3083_v20  ;;  %v2233_v63 = vpop.eup %2232  ;;  %v1104_v18 = vxor.u32 2147483648, %v2231_v7  ;;  %v974_v52 = vshrl.u32 %v3038_v16, %v972_v25 }
 0x184   :  { %v977_v46 = vadd.s32 127, %v976_v26  ;;  %v1120_v30 = vsel %vm1119_vm1, %v1118_v10, 0  ;;  %v1101_v35 = vxor.u32 2147483648, %v2233_v63  ;;  %v1270_v49 = vadd.s32 1, %v3076_v19 }
 0x185   :  { %v1115_v3 = vand.u32 8388607, %v1108_v12  ;;  %v1122_v8 = vand.u32 31, %v1120_v30  ;;  %v1105_v55 = vsel %vm1103_vm8, %v1104_v18, %v2233_v63  ;;  %v975_v5 = vor.u32 %v974_v52, %v973_v34 }
 0x186   :  { %v978_v27 = vshll.u32 %v977_v46, 23  ;;  %v987_v24 = vsel %vm902_vm10, %v986_v11, %v3019_v23  ;;  %v1102_v16 = vsel %vm1100_vm9, %v2231_v7, %v1101_v35  ;;  %v1267_v45 = vmul.u32 %v3051_v17, %v1251_v36 }
 0x187   :  { %vm1269_vm2 = vc.u32 %v3084_v58, %v3075_v1  ;;  %v1123_v15 = vsub.s32 32, %v1122_v8  ;;  %v1106_v57 = vsel %vm1099_vm13, %v1102_v16, %v1105_v55  ;;  %v351_v9 = vmul.f32 %v2861_v6, %v3032_v50 }
 0x188   :  { %v979_v31 = vor.u32 4788187, %v978_v27  ;;  %v1271_v37 = vsel %vm1269_vm2, %v1270_v49, %v3076_v19  ;;  %v1107_v23 = vsel %vm1096_vm14, nan, %v1106_v57  ;;  %v989_v39 = vsel %vm3066_vm15, 0, %v987_v24 }
 0x189   :  { %v1272_v17 = vadd.s32 %v1271_v37, %v1267_v45  ;;  %v1116_v47 = vor.u32 8388608, %v1115_v3  ;;  %2051 = vst.msk [vmem:[%s3779_s4 + $0x30] sm:$0xff] %vm2044_vm12, %v1107_v23  ;;  %v982_v38 = vcvt.s32.f32 %v975_v5  ;;  %v1126_v10 = vshrl.u32 %v2282_v48, %v1123_v15  ;;  %v272_v23 = vpop.permute.xlu1 %271 }
 0x18a   :  { %v980_v4 = vand.u32 2147483647, %v979_v31  ;;  %v1129_v41 = vshrl.u32 %v2283_v22, %v1123_v15  ;;  %v1121_v29 = vshrl.u32 %v1120_v30, 5  ;;  %v1125_v60 = vshll.u32 %v2281_v44, %v1122_v8 }
 0x18b   :  { %v1273_v50 = vadd.s32 536870912, %v1272_v17  ;;  %v1132_v13 = vshrl.u32 %v2284_v51, %v1123_v15  ;;  %v1128_v19 = vshll.u32 %v2282_v48, %v1122_v8  ;;  %v1134_v25 = vshll.u32 %v2284_v51, %v1122_v8 }
 0x18c   :  { %v983_v0 = vmul.f32 %v982_v38, %v980_v4  ;;  %v1135_v26 = vshrl.u32 %v2285_v53, %v1123_v15  ;;  %v1127_v36 = vor.u32 %v1126_v10, %v1125_v60  ;;  %v1131_v7 = vshll.u32 %v2283_v22, %v1122_v8 }
 0x18d   :  { %v1274_v11 = vshrl.u32 %v1273_v50, 30  ;;  %v1138_v34 = vshrl.u32 %v2286_v62, %v1123_v15  ;;  %v1130_v63 = vor.u32 %v1129_v41, %v1128_v19  ;;  %v1137_v52 = vshll.u32 %v2285_v53, %v1122_v8 }
 0x18e   :  { %v984_v20 = vxor.u32 2147483648, %v983_v0  ;;  %v1136_v18 = vor.u32 %v1135_v26, %v1134_v25  ;;  %v993_v46 = vadd.s32 3, %v989_v39  ;;  %v1133_v35 = vor.u32 %v1132_v13, %v1131_v7 }
 0x18f   :  { %v1275_v30 = vshll.u32 %v1274_v11, 30  ;;  %v1156_v49 = vshll.u32 %v1116_v47, 8  ;;  %v1124_v55 = vshrl.u32 %v2281_v44, %v1123_v15  ;;  %v1139_v5 = vor.u32 %v1138_v34, %v1137_v52 }
 0x190   :  { %v985_v3 = vsel %vm902_vm10, %v984_v20, %v983_v0  ;;  %v3127_v27 = vadd.f32 %v2888_v28, %v351_v9  ;;  %vm1140_vm3 = vcmp.lt.s32.totalorder %v1121_v29, 1  ;;  %vm1143_vm4 = vcmp.lt.s32.totalorder %v1121_v29, 4 }
 0x191   :  { %v988_v24 = vsel %vm3066_vm15, %v2891_v59, %v985_v3  ;;  %v3132_v16 = vsub.s32 %v1272_v17, %v1275_v30  ;;  %vm1141_vm5 = vcmp.lt.s32.totalorder %v1121_v29, 2  ;;  %v1148_v8 = vsel %vm1140_vm3, %v1127_v36, %v1130_v63 }
 0x192   :  { %2234 = vcosq.f32 %v988_v24  ;;  %v1149_v45 = vsel %vm1143_vm4, %v1136_v18, 920167782  ;;  %vm1142_vm6 = vcmp.lt.s32.totalorder %v1121_v29, 3  ;;  %v1145_v57 = vsel %vm1143_vm4, %v1133_v35, 2102212464 }
 0x193   :  { %2236 = vsinq.f32 %v988_v24  ;;  %v1278_v15 = vsub.s32 0, %v3132_v16  ;;  %v1298_v31 = vsub.s32 4, %v1274_v11  ;;  %v1150_v37 = vsel %vm1142_vm6, %v1133_v35, %v1149_v45 }
 0x194   :  { %v1152_v9 = vsel %vm1140_vm3, %v1130_v63, %v1133_v35  ;;  %v1153_v54 = vsel %vm1143_vm4, %v1139_v5, 1326507024  ;;  %v1144_v17 = vsel %vm1140_vm3, %v1124_v55, %v1127_v36  ;;  %v1151_v47 = vsel %vm1141_vm5, %v1148_v8, %v1150_v37 }
 0x195   :  { %v2100_v39 = vmin.u32 %v1278_v15, %v3132_v16  ;;  %v1154_v4 = vsel %vm1142_vm6, %v1136_v18, %v1153_v54  ;;  %v1146_v38 = vsel %vm1142_vm6, %v1130_v63, %v1145_v57  ;;  %v994_v60 = vand.u32 3, %v993_v46 }
 0x196   :  { %v1155_v10 = vsel %vm1141_vm5, %v1152_v9, %v1154_v4  ;;  %v3141_v41 = vmul.u32.u64.low %v1156_v49, %v1151_v47  ;;  %v3142_v50 = vmul.u32.u64.high %v1156_v49, %v1151_v47, %v3141_v41  ;;  %v311_v0 = vmul.f32 %v2416_v40, %v272_v23 }
 0x197   :  { %v1280_v13 = vclz %v2100_v39  ;;  %v3146_v19 = vmul.u32.u64.low %v1156_v49, %v1155_v10  ;;  %v3147_v25 = vmul.u32.u64.high %v1156_v49, %v1155_v10, %v3146_v19  ;;  %v1423_v26 = vand.u32 2139095040, %v3127_v27 }
 0x198   :  { %vm1214_vm7 = vcmp.lt.s32.totalorder %v2973_v56, 0  ;;  %v1147_v7 = vsel %vm1141_vm5, %v1144_v17, %v1146_v38  ;;  %vm3154_vm8 = vcmp.le.f32.partialorder %v1212_v61, 0.7853982  ;;  %v1166_v63 = vadd.s32 1, %v3142_v50  ;;  %v284_v38 = vpop.permute.xlu0 %283 }
 0x199   :  { %v2101_v36 = vadd.s32 4294967294, %v1280_v13  ;;  %v1299_v20 = vsel %vm1214_vm7, %v1298_v31, %v1274_v11  ;;  %v1424_v18 = vshrl.u32 %v1423_v26, 23  ;;  %vm996_vm10 = vcmp.eq.s32.totalorder %v994_v60, 0 }
 0x19a   :  { %v1268_v52 = vadd.s32 %v3075_v1, %v3084_v58  ;;  %v327_v29 = vadd.f32 %v311_v0, %v2404_v14  ;;  %vm992_vm9 = vweird.f32 %v2891_v59  ;;  %v1163_v61 = vmul.u32 %v1156_v49, %v1147_v7 }
 0x19b   :  { %vm2102_vm11 = vcmp.lt.s32.totalorder %v2101_v36, 0  ;;  %vm1165_vm13 = vc.u32 %v3147_v25, %v3141_v41  ;;  %v2107_v30 = vadd.s32 4294967169, %v1424_v18  ;;  %v1301_v3 = vsel %vm3154_vm8, 0, %v1299_v20 }
 0x19c   :  { %v1283_v46 = vsel %vm2102_vm11, 0, %v2101_v36  ;;  %v1167_v55 = vsel %vm1165_vm13, %v1166_v63, %v3142_v50  ;;  %vm999_vm14 = vcmp.eq.s32.totalorder %v994_v60, 2  ;;  %v1420_v58 = vand.u32 2147483647, %v3127_v27 }
 0x19d   :  { %v1284_v35 = vsub.s32 32, %v1283_v46  ;;  %v1288_v11 = vsub.s32 4294967266, %v1283_v46  ;;  %v1168_v1 = vadd.s32 %v1167_v55, %v1163_v61  ;;  %v1430_v14 = vadd.s32 1, %v2107_v30 }
 0x19e   :  { %v1285_v24 = vshll.u32 %v3132_v16, %v1283_v46  ;;  %v350_v45 = vmul.f32 %v2861_v6, %v327_v29  ;;  %v1305_v31 = vadd.s32 3, %v1301_v3  ;;  %v1427_v16 = vand.u32 8388607, %v1420_v58 }
 0x19f   :  { %v2235_v5 = vpop.eup %2234  ;;  %v1286_v49 = vshrl.u32 %v1268_v52, %v1284_v35  ;;  %v1289_v8 = vadd.s32 127, %v1288_v11  ;;  %v1169_v37 = vadd.s32 536870912, %v1168_v1  ;;  %vm1431_vm15 = vcmp.gt.s32.totalorder %v1430_v14, 0 }
 0x1a0   :  { %v2237_v15 = vpop.eup %2236  ;;  %v1000_v57 = vxor.u32 2147483648, %v2235_v5  ;;  %v1432_v39 = vsel %vm1431_vm15, %v1430_v14, 0  ;;  %vm995_vm0 = vcmp.lt.s32.totalorder %v994_v60, 2  ;;  %v3180_v50 = vadd.f32 %v2888_v28, %v350_v45 }
 0x1a1   :  { %v997_v9 = vxor.u32 2147483648, %v2237_v15  ;;  %v1287_v54 = vor.u32 %v1286_v49, %v1285_v24  ;;  %v1290_v23 = vshll.u32 %v1289_v8, 23  ;;  %v3174_v47 = vshrl.u32 %v1169_v37, 30 }
 0x1a2   :  { %v1001_v17 = vsel %vm999_vm14, %v1000_v57, %v2237_v15  ;;  %v1434_v4 = vand.u32 31, %v1432_v39  ;;  %v3182_v0 = vand.u32 3, %v1305_v31  ;;  %v3188_v63 = vmul.f32 %v2416_v40, %v284_v38 }
 0x1a3   :  { %v998_v6 = vsel %vm996_vm10, %v2235_v5, %v997_v9  ;;  %v1291_v10 = vor.u32 4788187, %v1290_v23  ;;  %v1171_v19 = vshll.u32 %v3174_v47, 30  ;;  %v1294_v20 = vcvt.s32.f32 %v1287_v54 }
 0x1a4   :  { %v1002_v13 = vsel %vm995_vm0, %v998_v6, %v1001_v17  ;;  %v1435_v26 = vsub.s32 32, %v1434_v4  ;;  %v1164_v28 = vadd.s32 %v3141_v41, %v3147_v25  ;;  %v1428_v18 = vor.u32 8388608, %v1427_v16 }
 0x1a5   :  { %v1003_v36 = vsel %vm992_vm9, nan, %v1002_v13  ;;  %v1292_v7 = vand.u32 2147483647, %v1291_v10  ;;  %v3196_v60 = vsub.s32 %v1168_v1, %v1171_v19  ;;  %v1437_v29 = vshll.u32 %v2281_v44, %v1434_v4 }
 0x1a6   :  { %2050 = vst.msk [vmem:[%s3779_s4 + $0x28] sm:$0xff] %vm2044_vm12, %v1003_v36  ;;  %v1438_v52 = vshrl.u32 %v2282_v48, %v1435_v26  ;;  %v1441_v46 = vshrl.u32 %v2283_v22, %v1435_v26  ;;  %v1319_v61 = vand.u32 2139095040, %v3180_v50  ;;  %v1440_v35 = vshll.u32 %v2282_v48, %v1434_v4 }
 0x1a7   :  { %v1295_v59 = vmul.f32 %v1294_v20, %v1292_v7  ;;  %v1174_v30 = vsub.s32 0, %v3196_v60  ;;  %v1443_v11 = vshll.u32 %v2283_v22, %v1434_v4  ;;  %v1444_v41 = vshrl.u32 %v2284_v51, %v1435_v26 }
 0x1a8   :  { %v1433_v3 = vshrl.u32 %v1432_v39, 5  ;;  %v1446_v55 = vshll.u32 %v2284_v51, %v1434_v4  ;;  %v1447_v1 = vshrl.u32 %v2285_v53, %v1435_v26  ;;  %v1439_v5 = vor.u32 %v1438_v52, %v1437_v29 }
 0x1a9   :  { %v1296_v25 = vxor.u32 2147483648, %v1295_v59  ;;  %v2096_v14 = vmin.u32 %v1174_v30, %v3196_v60  ;;  %v1442_v24 = vor.u32 %v1441_v46, %v1440_v35  ;;  %v1445_v49 = vor.u32 %v1444_v41, %v1443_v11 }
 0x1aa   :  { %v1448_v45 = vor.u32 %v1447_v1, %v1446_v55  ;;  %v1449_v15 = vshll.u32 %v2285_v53, %v1434_v4  ;;  %v1450_v57 = vshrl.u32 %v2286_v62, %v1435_v26  ;;  %vm1110_vm1 = vcmp.lt.s32.totalorder %v3008_v2, 0 }
 0x1ab   :  { %v1297_v8 = vsel %vm1214_vm7, %v1296_v25, %v1295_v59  ;;  %v1176_v37 = vclz %v2096_v14  ;;  %v1468_v9 = vshll.u32 %v1428_v18, 8  ;;  %v1320_v54 = vshrl.u32 %v1319_v61, 23 }
 0x1ac   :  { %v1300_v31 = vsel %vm3154_vm8, %v2973_v56, %v1297_v8  ;;  %v1194_v23 = vsub.s32 4, %v3174_v47  ;;  %v1436_v39 = vshrl.u32 %v2281_v44, %v1435_v26  ;;  %v1451_v17 = vor.u32 %v1450_v57, %v1449_v15 }
 0x1ad   :  { %2238 = vcosq.f32 %v1300_v31  ;;  %v2097_v16 = vadd.s32 4294967294, %v1176_v37  ;;  %vm1452_vm2 = vcmp.lt.s32.totalorder %v1433_v3, 1  ;;  %vm1455_vm3 = vcmp.lt.s32.totalorder %v1433_v3, 4 }
 0x1ae   :  { %2240 = vsinq.f32 %v1300_v31  ;;  %vm1454_vm4 = vcmp.lt.s32.totalorder %v1433_v3, 3  ;;  %v1457_v4 = vsel %vm1455_vm3, %v1445_v49, 2102212464  ;;  %v1460_v38 = vsel %vm1452_vm2, %v1439_v5, %v1442_v24  ;;  %v292_v31 = vpop.permute.xlu0 %291 }
 0x1af   :  { %v1461_v34 = vsel %vm1455_vm3, %v1448_v45, 920167782  ;;  %vm2098_vm5 = vcmp.lt.s32.totalorder %v2097_v16, 0  ;;  %vm1453_vm6 = vcmp.lt.s32.totalorder %v1433_v3, 2  ;;  %v1464_v10 = vsel %vm1452_vm2, %v1442_v24, %v1445_v49 }
 0x1b0   :  { %v1462_v6 = vsel %vm1454_vm4, %v1445_v49, %v1461_v34  ;;  %v1179_v13 = vsel %vm2098_vm5, 0, %v2097_v16  ;;  %v1456_v19 = vsel %vm1452_vm2, %v1436_v39, %v1439_v5  ;;  %v1465_v7 = vsel %vm1455_vm3, %v1451_v17, 1326507024 }
 0x1b1   :  { %v1463_v36 = vsel %vm1453_vm6, %v1460_v38, %v1462_v6  ;;  %v1180_v20 = vsub.s32 32, %v1179_v13  ;;  %v1184_v26 = vsub.s32 4294967266, %v1179_v13  ;;  %v1458_v18 = vsel %vm1454_vm4, %v1442_v24, %v1457_v4 }
 0x1b2   :  { %v1466_v52 = vsel %vm1454_vm4, %v1448_v45, %v1465_v7  ;;  %v1181_v59 = vshll.u32 %v3196_v60, %v1179_v13  ;;  %v3222_v46 = vmul.u32.u64.low %v1468_v9, %v1463_v36  ;;  %v3223_v61 = vmul.u32.u64.high %v1468_v9, %v1463_v36, %v3222_v46 }
 0x1b3   :  { %v1467_v29 = vsel %vm1453_vm6, %v1464_v10, %v1466_v52  ;;  %v1182_v30 = vshrl.u32 %v1164_v28, %v1180_v20  ;;  %v1185_v35 = vadd.s32 127, %v1184_v26  ;;  %v1195_v25 = vsel %vm1110_vm1, %v1194_v23, %v3174_v47 }
 0x1b4   :  { %v3226_v11 = vmul.u32.u64.low %v1468_v9, %v1467_v29  ;;  %v3227_v41 = vmul.u32.u64.high %v1468_v9, %v1467_v29, %v3226_v11  ;;  %v1459_v55 = vsel %vm1453_vm6, %v1456_v19, %v1458_v18  ;;  %v1316_v1 = vand.u32 2147483647, %v3180_v50  ;;  %v3265_v18 = vld [vmem:[%s3777_s2] ss:$0 sm:$0xff] }
 0x1b5   :  { %v2103_v60 = vadd.s32 4294967169, %v1320_v54  ;;  %vm3236_vm7 = vcmp.le.f32.partialorder %v1108_v12, 0.7853982  ;;  %v1183_v28 = vor.u32 %v1182_v30, %v1181_v59  ;;  %v1186_v5 = vshll.u32 %v1185_v35, 23  ;;  %v280_v12 = vpop.permute.xlu1 %279 }
 0x1b6   :  { %vm1304_vm8 = vweird.f32 %v2973_v56  ;;  %vm1307_vm10 = vcmp.lt.s32.totalorder %v3182_v0, 2  ;;  %vm1308_vm11 = vcmp.eq.s32.totalorder %v3182_v0, 0  ;;  %v1478_v47 = vadd.s32 1, %v3223_v61 }
 0x1b7   :  { %v1326_v3 = vadd.s32 1, %v2103_v60  ;;  %v1187_v24 = vor.u32 4788187, %v1186_v5  ;;  %v1197_v49 = vsel %vm3236_vm7, 0, %v1195_v25  ;;  %v1475_v8 = vmul.u32 %v1468_v9, %v1459_v55 }
 0x1b8   :  { %vm1477_vm9 = vc.u32 %v3227_v41, %v3222_v46  ;;  %v1323_v15 = vand.u32 8388607, %v1316_v1  ;;  %v330_v57 = vadd.f32 %v3188_v63, %v2411_v32  ;;  %v1190_v23 = vcvt.s32.f32 %v1183_v28 }
 0x1b9   :  { %v1479_v45 = vsel %vm1477_vm9, %v1478_v47, %v3223_v61  ;;  %vm1327_vm13 = vcmp.gt.s32.totalorder %v1326_v3, 0  ;;  %v1188_v54 = vand.u32 2147483647, %v1187_v24  ;;  %vm1311_vm14 = vcmp.eq.s32.totalorder %v3182_v0, 2 }
 0x1ba   :  { %v2239_v37 = vpop.eup %2238  ;;  %v1480_v39 = vadd.s32 %v1479_v45, %v1475_v8  ;;  %v1328_v17 = vsel %vm1327_vm13, %v1326_v3, 0  ;;  %v3255_v38 = vmul.f32 %v2416_v40, %v280_v12  ;;  %v3258_v13 = vmul.f32 %v2416_v40, %v292_v31 }
 0x1bb   :  { %v2241_v9 = vpop.eup %2240  ;;  %v1312_v16 = vxor.u32 2147483648, %v2239_v37  ;;  %v1330_v4 = vand.u32 31, %v1328_v17  ;;  %v1191_v6 = vmul.f32 %v1190_v23, %v1188_v54  ;;  %v1201_v63 = vadd.s32 3, %v1197_v49  ;;  %v3301_v54 = vld [vmem:[%s3778_s3] ss:$0 sm:$0xff] }
 0x1bc   :  { %v1309_v34 = vxor.u32 2147483648, %v2241_v9  ;;  %v1481_v10 = vadd.s32 536870912, %v1480_v39  ;;  %v1324_v19 = vor.u32 8388608, %v1323_v15  ;;  %v353_v52 = vmul.f32 %v3265_v18, %v330_v57 }
 0x1bd   :  { %v1313_v32 = vsel %vm1311_vm14, %v1312_v16, %v2241_v9  ;;  %v1331_v36 = vsub.s32 32, %v1330_v4  ;;  %v1192_v20 = vxor.u32 2147483648, %v1191_v6  ;;  %v1333_v29 = vshll.u32 %v2281_v44, %v1330_v4 }
 0x1be   :  { %v1310_v7 = vsel %vm1308_vm11, %v2239_v37, %v1309_v34  ;;  %v1482_v26 = vshrl.u32 %v1481_v10, 30  ;;  %v1336_v55 = vshll.u32 %v2282_v48, %v1330_v4  ;;  %v1329_v60 = vshrl.u32 %v1328_v17, 5 }
 0x1bf   :  { %v1314_v59 = vsel %vm1307_vm10, %v1310_v7, %v1313_v32  ;;  %v1334_v61 = vshrl.u32 %v2282_v48, %v1331_v36  ;;  %v1337_v30 = vshrl.u32 %v2283_v22, %v1331_v36  ;;  %v1193_v11 = vsel %vm1110_vm1, %v1192_v20, %v1191_v6 }
 0x1c0   :  { %v1315_v35 = vsel %vm1304_vm8, nan, %v1314_v59  ;;  %v1483_v25 = vshll.u32 %v1482_v26, 30  ;;  %v1196_v0 = vsel %vm3236_vm7, %v3008_v2, %v1193_v11  ;;  %v1339_v28 = vshll.u32 %v2283_v22, %v1330_v4 }
 0x1c1   :  { %2053 = vst.msk [vmem:[%s3779_s4 + $0x40] sm:$0xff] %vm2044_vm12, %v1315_v35  ;;  %v1340_v56 = vshrl.u32 %v2284_v51, %v1331_v36  ;;  %2242 = vcosq.f32 %v1196_v0  ;;  %vm1422_vm15 = vcmp.lt.s32.totalorder %v3127_v27, 0  ;;  %v1335_v47 = vor.u32 %v1334_v61, %v1333_v29 }
 0x1c2   :  { %v3288_v5 = vsub.s32 %v1480_v39, %v1483_v25  ;;  %v1338_v3 = vor.u32 %v1337_v30, %v1336_v55  ;;  %2244 = vsinq.f32 %v1196_v0  ;;  %v1342_v49 = vshll.u32 %v2284_v51, %v1330_v4 }
 0x1c3   :  { %v1341_v24 = vor.u32 %v1340_v56, %v1339_v28  ;;  %v1343_v8 = vshrl.u32 %v2285_v53, %v1331_v36  ;;  %v3292_v14 = vand.u32 3, %v1201_v63  ;;  %v1345_v45 = vshll.u32 %v2285_v53, %v1330_v4 }
 0x1c4   :  { %v1486_v12 = vsub.s32 0, %v3288_v5  ;;  %v1346_v15 = vshrl.u32 %v2286_v62, %v1331_v36  ;;  %v1332_v57 = vshrl.u32 %v2281_v44, %v1331_v36  ;;  %v1364_v37 = vshll.u32 %v1324_v19, 8 }
 0x1c5   :  { %v1344_v31 = vor.u32 %v1343_v8, %v1342_v49  ;;  %v3304_v23 = vadd.f32 %v3301_v54, %v353_v52  ;;  %vm3308_vm0 = vcmp.le.f32.partialorder %v1420_v58, 0.7853982  ;;  %vm1348_vm1 = vcmp.lt.s32.totalorder %v1329_v60, 1 }
 0x1c6   :  { %v2108_v17 = vmin.u32 %v1486_v12, %v3288_v5  ;;  %v1347_v9 = vor.u32 %v1346_v15, %v1345_v45  ;;  %vm1351_vm2 = vcmp.lt.s32.totalorder %v1329_v60, 4  ;;  %v1506_v16 = vsub.s32 4, %v1482_v26 }
 0x1c7   :  { %v1353_v4 = vsel %vm1351_vm2, %v1341_v24, 2102212464  ;;  %v1356_v34 = vsel %vm1348_vm1, %v1335_v47, %v1338_v3  ;;  %v1357_v6 = vsel %vm1351_vm2, %v1344_v31, 920167782  ;;  %vm1349_vm3 = vcmp.lt.s32.totalorder %v1329_v60, 2 }
 0x1c8   :  { %v1488_v10 = vclz %v2108_v17  ;;  %vm1350_vm4 = vcmp.lt.s32.totalorder %v1329_v60, 3  ;;  %v1352_v32 = vsel %vm1348_vm1, %v1332_v57, %v1335_v47  ;;  %v1360_v36 = vsel %vm1348_vm1, %v1338_v3, %v1341_v24 }
 0x1c9   :  { %v1354_v63 = vsel %vm1350_vm4, %v1338_v3, %v1353_v4  ;;  %v1358_v19 = vsel %vm1350_vm4, %v1341_v24, %v1357_v6  ;;  %v1361_v58 = vsel %vm1351_vm2, %v1347_v9, 1326507024  ;;  %vm1204_vm5 = vcmp.eq.s32.totalorder %v3292_v14, 0 }
 0x1ca   :  { %v2109_v7 = vadd.s32 4294967294, %v1488_v10  ;;  %v1359_v20 = vsel %vm1349_vm3, %v1356_v34, %v1358_v19  ;;  %v1362_v52 = vsel %vm1350_vm4, %v1344_v31, %v1361_v58  ;;  %vm1203_vm6 = vcmp.lt.s32.totalorder %v3292_v14, 2 }
 0x1cb   :  { %v1507_v59 = vsel %vm1422_vm15, %v1506_v16, %v1482_v26  ;;  %v1363_v29 = vsel %vm1349_vm3, %v1360_v36, %v1362_v52  ;;  %v3319_v61 = vmul.u32.u64.low %v1364_v37, %v1359_v20  ;;  %v3320_v30 = vmul.u32.u64.high %v1364_v37, %v1359_v20, %v3319_v61 }
 0x1cc   :  { %vm2110_vm7 = vcmp.lt.s32.totalorder %v2109_v7, 0  ;;  %v1355_v35 = vsel %vm1349_vm3, %v1352_v32, %v1354_v63  ;;  %v3324_v11 = vmul.u32.u64.low %v1364_v37, %v1363_v29  ;;  %v3325_v25 = vmul.u32.u64.high %v1364_v37, %v1363_v29, %v3324_v11 }
 0x1cd   :  { %vm1207_vm8 = vcmp.eq.s32.totalorder %v3292_v14, 2  ;;  %v1491_v55 = vsel %vm2110_vm7, 0, %v2109_v7  ;;  %v1628_v0 = vand.u32 2147483647, %v3304_v23  ;;  %v1631_v28 = vand.u32 2139095040, %v3304_v23 }
 0x1ce   :  { %v1476_v26 = vadd.s32 %v3222_v46, %v3227_v41  ;;  %v1492_v56 = vsub.s32 32, %v1491_v55  ;;  %v1496_v47 = vsub.s32 4294967266, %v1491_v55  ;;  %v329_v3 = vadd.f32 %v3255_v38, %v2408_v21  ;;  %v2243_v60 = vpop.eup %2242 }
 0x1cf   :  { %v1509_v24 = vsel %vm3308_vm0, 0, %v1507_v59  ;;  %v1371_v49 = vmul.u32 %v1364_v37, %v1355_v35  ;;  %v1374_v8 = vadd.s32 1, %v3320_v30  ;;  %v1632_v12 = vshrl.u32 %v1631_v28, 23  ;;  %v2245_v45 = vpop.eup %2244 }
 0x1d0   :  { %v1208_v15 = vxor.u32 2147483648, %v2243_v60  ;;  %v1493_v57 = vshll.u32 %v3288_v5, %v1491_v55  ;;  %v1494_v31 = vshrl.u32 %v1476_v26, %v1492_v56  ;;  %v1497_v17 = vadd.s32 127, %v1496_v47 }
 0x1d1   :  { %v1205_v46 = vxor.u32 2147483648, %v2245_v45  ;;  %vm1373_vm10 = vc.u32 %v3325_v25, %v3319_v61  ;;  %v2115_v41 = vadd.s32 4294967169, %v1632_v12  ;;  %v1635_v21 = vand.u32 8388607, %v1628_v0 }
 0x1d2   :  { %v1209_v38 = vsel %vm1207_vm8, %v1208_v15, %v2245_v45  ;;  %v1495_v37 = vor.u32 %v1494_v31, %v1493_v57  ;;  %v1498_v9 = vshll.u32 %v1497_v17, 23  ;;  %v1375_v16 = vsel %vm1373_vm10, %v1374_v8, %v3320_v30 }
 0x1d3   :  { %v1206_v5 = vsel %vm1204_vm5, %v2243_v60, %v1205_v46  ;;  %v1376_v4 = vadd.s32 %v1375_v16, %v1371_v49  ;;  %v1638_v34 = vadd.s32 1, %v2115_v41  ;;  %v352_v6 = vmul.f32 %v3265_v18, %v329_v3 }
 0x1d4   :  { %vm1200_vm11 = vweird.f32 %v3008_v2  ;;  %v1210_v10 = vsel %vm1203_vm6, %v1206_v5, %v1209_v38  ;;  %v1499_v32 = vor.u32 4788187, %v1498_v9  ;;  %v332_v63 = vadd.f32 %v3258_v13, %v2420_v42 }
 0x1d5   :  { %v1211_v19 = vsel %vm1200_vm11, nan, %v1210_v10  ;;  %v1513_v36 = vadd.s32 3, %v1509_v24  ;;  %v1377_v58 = vadd.s32 536870912, %v1376_v4  ;;  %vm1639_vm9 = vcmp.gt.s32.totalorder %v1638_v34, 0 }
 0x1d6   :  { %2052 = vst.msk [vmem:[%s3779_s4 + $0x38] sm:$0xff] %vm2044_vm12, %v1211_v19  ;;  %v1500_v7 = vand.u32 2147483647, %v1499_v32  ;;  %v1502_v20 = vcvt.s32.f32 %v1495_v37  ;;  %v1636_v52 = vor.u32 8388608, %v1635_v21  ;;  %v1640_v2 = vsel %vm1639_vm9, %v1638_v34, 0 }
 0x1d7   :  { %v3357_v59 = vshrl.u32 %v1377_v58, 30  ;;  %v1642_v14 = vand.u32 31, %v1640_v2  ;;  %v3360_v29 = vadd.f32 %v3301_v54, %v352_v6  ;;  %v3363_v11 = vand.u32 3, %v1513_v36 }
 0x1d8   :  { %v1503_v42 = vmul.f32 %v1502_v20, %v1500_v7  ;;  %v3365_v55 = vshll.u32 %v1636_v52, 8  ;;  %v3368_v28 = vmul.f32 %v3265_v18, %v332_v63  ;;  %v1641_v56 = vshrl.u32 %v1640_v2, 5 }
 0x1d9   :  { %v1379_v13 = vshll.u32 %v3357_v59, 30  ;;  %v1643_v30 = vsub.s32 32, %v1642_v14  ;;  %v1527_v3 = vand.u32 2139095040, %v3360_v29  ;;  %v1645_v24 = vshll.u32 %v2281_v44, %v1642_v14 }
 0x1da   :  { %v1504_v35 = vxor.u32 2147483648, %v1503_v42  ;;  %v1648_v15 = vshll.u32 %v2282_v48, %v1642_v14  ;;  %v1651_v57 = vshll.u32 %v2283_v22, %v1642_v14  ;;  %v1654_v17 = vshll.u32 %v2284_v51, %v1642_v14 }
 0x1db   :  { %v3370_v26 = vsub.s32 %v1376_v4, %v1379_v13  ;;  %v1646_v47 = vshrl.u32 %v2282_v48, %v1643_v30  ;;  %v1649_v49 = vshrl.u32 %v2283_v22, %v1643_v30  ;;  %v1652_v8 = vshrl.u32 %v2284_v51, %v1643_v30 }
 0x1dc   :  { %v1505_v60 = vsel %vm1422_vm15, %v1504_v35, %v1503_v42  ;;  %v1655_v46 = vshrl.u32 %v2285_v53, %v1643_v30  ;;  %v1657_v39 = vshll.u32 %v2285_v53, %v1642_v14  ;;  %v1658_v9 = vshrl.u32 %v2286_v62, %v1643_v30 }
 0x1dd   :  { %v1508_v12 = vsel %vm3308_vm0, %v3127_v27, %v1505_v60  ;;  %v1382_v45 = vsub.s32 0, %v3370_v26  ;;  %v1647_v31 = vor.u32 %v1646_v47, %v1645_v24  ;;  %v1650_v21 = vor.u32 %v1649_v49, %v1648_v15 }
 0x1de   :  { %2246 = vcosq.f32 %v1508_v12  ;;  %v1653_v38 = vor.u32 %v1652_v8, %v1651_v57  ;;  %v1656_v37 = vor.u32 %v1655_v46, %v1654_v17  ;;  %v1528_v16 = vshrl.u32 %v1527_v3, 23 }
 0x1df   :  { %2248 = vsinq.f32 %v1508_v12  ;;  %v2104_v41 = vmin.u32 %v1382_v45, %v3370_v26  ;;  %vm1318_vm13 = vcmp.lt.s32.totalorder %v3180_v50, 0  ;;  %v1402_v4 = vsub.s32 4, %v3357_v59 }
 0x1e0   :  { %v1644_v34 = vshrl.u32 %v2281_v44, %v1643_v30  ;;  %vm1660_vm14 = vcmp.lt.s32.totalorder %v1641_v56, 1  ;;  %v1659_v6 = vor.u32 %v1658_v9, %v1657_v39  ;;  %vm1661_vm15 = vcmp.lt.s32.totalorder %v1641_v56, 2 }
 0x1e1   :  { %v1384_v5 = vclz %v2104_v41  ;;  %vm1662_vm0 = vcmp.lt.s32.totalorder %v1641_v56, 3  ;;  %vm1663_vm1 = vcmp.lt.s32.totalorder %v1641_v56, 4  ;;  %v1668_v63 = vsel %vm1660_vm14, %v1647_v31, %v1650_v21 }
 0x1e2   :  { %v1665_v32 = vsel %vm1663_vm1, %v1653_v38, 2102212464  ;;  %v1669_v19 = vsel %vm1663_vm1, %v1656_v37, 920167782  ;;  %vm3395_vm2 = vcmp.le.f32.partialorder %v1316_v1, 0.7853982  ;;  %v1664_v58 = vsel %vm1660_vm14, %v1644_v34, %v1647_v31 }
 0x1e3   :  { %v2105_v10 = vadd.s32 4294967294, %v1384_v5  ;;  %v1670_v7 = vsel %vm1662_vm0, %v1653_v38, %v1669_v19  ;;  %v1672_v20 = vsel %vm1660_vm14, %v1650_v21, %v1653_v38  ;;  %v1673_v52 = vsel %vm1663_vm1, %v1659_v6, 1326507024 }
 0x1e4   :  { %v1666_v2 = vsel %vm1662_vm0, %v1650_v21, %v1665_v32  ;;  %v1671_v14 = vsel %vm1661_vm15, %v1668_v63, %v1670_v7  ;;  %v1674_v42 = vsel %vm1662_vm0, %v1656_v37, %v1673_v52  ;;  %vm1515_vm4 = vcmp.lt.s32.totalorder %v3363_v11, 2 }
 0x1e5   :  { %vm2106_vm3 = vcmp.lt.s32.totalorder %v2105_v10, 0  ;;  %v1675_v30 = vsel %vm1661_vm15, %v1672_v20, %v1674_v42  ;;  %v3402_v35 = vmul.u32.u64.low %v3365_v55, %v1671_v14  ;;  %v3403_v47 = vmul.u32.u64.high %v3365_v55, %v1671_v14, %v3402_v35 }
 0x1e6   :  { %v1387_v13 = vsel %vm2106_vm3, 0, %v2105_v10  ;;  %v1372_v1 = vadd.s32 %v3319_v61, %v3325_v25  ;;  %v1524_v24 = vand.u32 2147483647, %v3360_v29  ;;  %vm1516_vm5 = vcmp.eq.s32.totalorder %v3363_v11, 0 }
 0x1e7   :  { %v1388_v3 = vsub.s32 32, %v1387_v13  ;;  %v1392_v60 = vsub.s32 4294967266, %v1387_v13  ;;  %v3412_v49 = vmul.u32.u64.low %v3365_v55, %v1675_v30  ;;  %v3413_v8 = vmul.u32.u64.high %v3365_v55, %v1675_v30, %v3412_v49 }
 0x1e8   :  { %v2111_v12 = vadd.s32 4294967169, %v1528_v16  ;;  %v1389_v45 = vshll.u32 %v3370_v26, %v1387_v13  ;;  %v1667_v31 = vsel %vm1661_vm15, %v1664_v58, %v1666_v2  ;;  %v1403_v61 = vsel %vm1318_vm13, %v1402_v4, %v3357_v59 }
 0x1e9   :  { %v1390_v15 = vshrl.u32 %v1372_v1, %v1388_v3  ;;  %v1393_v57 = vadd.s32 127, %v1392_v60  ;;  %v1686_v25 = vadd.s32 1, %v3403_v47  ;;  %v3423_v46 = vadd.f32 %v3301_v54, %v3368_v28 }
 0x1ea   :  { %v1534_v17 = vadd.s32 1, %v2111_v12  ;;  %vm1519_vm6 = vcmp.eq.s32.totalorder %v3363_v11, 2  ;;  %v3428_v56 = vand.u32 8388607, %v1524_v24  ;;  %v1683_v59 = vmul.u32 %v3365_v55, %v1667_v31 }
 0x1eb   :  { %v2247_v41 = vpop.eup %2246  ;;  %v1391_v21 = vor.u32 %v1390_v15, %v1389_v45  ;;  %v1394_v26 = vshll.u32 %v1393_v57, 23  ;;  %vm1685_vm7 = vc.u32 %v3413_v8, %v3402_v35  ;;  %v1405_v9 = vsel %vm3395_vm2, 0, %v1403_v61 }
 0x1ec   :  { %v2249_v38 = vpop.eup %2248  ;;  %v1520_v37 = vxor.u32 2147483648, %v2247_v41  ;;  %vm1535_vm8 = vcmp.gt.s32.totalorder %v1534_v17, 0  ;;  %v1687_v16 = vsel %vm1685_vm7, %v1686_v25, %v3403_v47  ;;  %v1839_v6 = vand.u32 2139095040, %v3423_v46 }
 0x1ed   :  { %v1517_v39 = vxor.u32 2147483648, %v2249_v38  ;;  %v1395_v28 = vor.u32 4788187, %v1394_v26  ;;  %v1688_v4 = vadd.s32 %v1687_v16, %v1683_v59  ;;  %v1536_v34 = vsel %vm1535_vm8, %v1534_v17, 0 }
 0x1ee   :  { %v1521_v5 = vsel %vm1519_vm6, %v1520_v37, %v2249_v38  ;;  %v1398_v32 = vcvt.s32.f32 %v1391_v21  ;;  %v1538_v63 = vand.u32 31, %v1536_v34  ;;  %vm1512_vm10 = vweird.f32 %v3127_v27 }
 0x1ef   :  { %v1518_v10 = vsel %vm1516_vm5, %v2247_v41, %v1517_v39  ;;  %v1396_v55 = vand.u32 2147483647, %v1395_v28  ;;  %v1689_v58 = vadd.s32 536870912, %v1688_v4  ;;  %v1532_v52 = vor.u32 8388608, %v3428_v56 }
 0x1f0   :  { %v1522_v19 = vsel %vm1515_vm4, %v1518_v10, %v1521_v5  ;;  %v1539_v2 = vsub.s32 32, %v1538_v63  ;;  %v1409_v14 = vadd.s32 3, %v1405_v9  ;;  %v1541_v13 = vshll.u32 %v2281_v44, %v1538_v63 }
 0x1f1   :  { %v1523_v7 = vsel %vm1512_vm10, nan, %v1522_v19  ;;  %v1399_v20 = vmul.f32 %v1398_v32, %v1396_v55  ;;  %v3447_v42 = vshrl.u32 %v1689_v58, 30  ;;  %v1840_v27 = vshrl.u32 %v1839_v6, 23 }
 0x1f2   :  { %2055 = vst.msk [vmem:[%s3779_s4 + $0x50] sm:$0xff] %vm2044_vm12, %v1523_v7  ;;  %v1542_v11 = vshrl.u32 %v2282_v48, %v1539_v2  ;;  %v1544_v47 = vshll.u32 %v2282_v48, %v1538_v63  ;;  %v1545_v1 = vshrl.u32 %v2283_v22, %v1539_v2  ;;  %v1547_v60 = vshll.u32 %v2283_v22, %v1538_v63 }
 0x1f3   :  { %v1400_v30 = vxor.u32 2147483648, %v1399_v20  ;;  %v1691_v3 = vshll.u32 %v3447_v42, 30  ;;  %v1548_v49 = vshrl.u32 %v2284_v51, %v1539_v2  ;;  %v1551_v12 = vshrl.u32 %v2285_v53, %v1539_v2 }
 0x1f4   :  { %v1537_v15 = vshrl.u32 %v1536_v34, 5  ;;  %v1543_v57 = vor.u32 %v1542_v11, %v1541_v13  ;;  %v1550_v31 = vshll.u32 %v2284_v51, %v1538_v63  ;;  %v1546_v17 = vor.u32 %v1545_v1, %v1544_v47 }
 0x1f5   :  { %v1401_v45 = vsel %vm1318_vm13, %v1400_v30, %v1399_v20  ;;  %v3463_v25 = vsub.s32 %v1688_v4, %v1691_v3  ;;  %v1549_v41 = vor.u32 %v1548_v49, %v1547_v60  ;;  %v1553_v26 = vshll.u32 %v2285_v53, %v1538_v63 }
 0x1f6   :  { %v1404_v61 = vsel %vm3395_vm2, %v3180_v50, %v1401_v45  ;;  %v1552_v21 = vor.u32 %v1551_v12, %v1550_v31  ;;  %v1554_v56 = vshrl.u32 %v2286_v62, %v1539_v2  ;;  %v3467_v38 = vand.u32 3, %v1409_v14 }
 0x1f7   :  { %2250 = vcosq.f32 %v1404_v61  ;;  %v1694_v37 = vsub.s32 0, %v3463_v25  ;;  %v1836_v59 = vand.u32 2147483647, %v3423_v46  ;;  %v1540_v36 = vshrl.u32 %v2281_v44, %v1539_v2 }
 0x1f8   :  { %2252 = vsinq.f32 %v1404_v61  ;;  %v1555_v39 = vor.u32 %v1554_v56, %v1553_v26  ;;  %vm1559_vm11 = vcmp.lt.s32.totalorder %v1537_v15, 4  ;;  %v2123_v28 = vadd.s32 4294967169, %v1840_v27 }
 0x1f9   :  { %v2116_v9 = vmin.u32 %v1694_v37, %v3463_v25  ;;  %vm1556_vm9 = vcmp.lt.s32.totalorder %v1537_v15, 1  ;;  %vm1558_vm13 = vcmp.lt.s32.totalorder %v1537_v15, 3  ;;  %v1561_v16 = vsel %vm1559_vm11, %v1549_v41, 2102212464 }
 0x1fa   :  { %v1560_v5 = vsel %vm1556_vm9, %v1540_v36, %v1543_v57  ;;  %v1562_v4 = vsel %vm1558_vm13, %v1546_v17, %v1561_v16  ;;  %v1564_v34 = vsel %vm1556_vm9, %v1543_v57, %v1546_v17  ;;  %v1565_v6 = vsel %vm1559_vm11, %v1552_v21, 920167782 }
 0x1fb   :  { %vm1630_vm14 = vcmp.lt.s32.totalorder %v3304_v23, 0  ;;  %v1696_v10 = vclz %v2116_v9  ;;  %v1568_v55 = vsel %vm1556_vm9, %v1546_v17, %v1549_v41  ;;  %v1572_v32 = vshll.u32 %v1532_v52, 8 }
 0x1fc   :  { %v3479_v63 = vand.u32 8388607, %v1836_v59  ;;  %vm1557_vm15 = vcmp.lt.s32.totalorder %v1537_v15, 2  ;;  %v1566_v19 = vsel %vm1558_vm13, %v1549_v41, %v1565_v6  ;;  %v1569_v58 = vsel %vm1559_vm11, %v1555_v39, 1326507024 }
 0x1fd   :  { %v1846_v7 = vadd.s32 1, %v2123_v28  ;;  %v2117_v20 = vadd.s32 4294967294, %v1696_v10  ;;  %v1563_v2 = vsel %vm1557_vm15, %v1560_v5, %v1562_v4  ;;  %v1567_v14 = vsel %vm1557_vm15, %v1564_v34, %v1566_v19 }
 0x1fe   :  { %v1570_v13 = vsel %vm1558_vm13, %v1552_v21, %v1569_v58  ;;  %v3484_v30 = vmul.u32.u64.low %v1572_v32, %v1567_v14  ;;  %v3485_v11 = vmul.u32.u64.high %v1572_v32, %v1567_v14, %v3484_v30  ;;  %vm1411_vm1 = vcmp.lt.s32.totalorder %v3467_v38, 2 }
 0x1ff   :  { %v1571_v27 = vsel %vm1557_vm15, %v1568_v55, %v1570_v13  ;;  %vm1847_vm0 = vcmp.gt.s32.totalorder %v1846_v7, 0  ;;  %vm2118_vm2 = vcmp.lt.s32.totalorder %v2117_v20, 0  ;;  %vm1408_vm3 = vweird.f32 %v3180_v50 }
 0x200   :  { %v3489_v52 = vmul.u32.u64.low %v1572_v32, %v1571_v27  ;;  %v3490_v47 = vmul.u32.u64.high %v1572_v32, %v1571_v27, %v3489_v52  ;;  %v1848_v1 = vsel %vm1847_vm0, %v1846_v7, 0  ;;  %vm1412_vm4 = vcmp.eq.s32.totalorder %v3467_v38, 0 }
 0x201   :  { %v1699_v3 = vsel %vm2118_vm2, 0, %v2117_v20  ;;  %v1714_v60 = vsub.s32 4, %v3447_v42  ;;  %v1850_v49 = vand.u32 31, %v1848_v1  ;;  %vm1415_vm5 = vcmp.eq.s32.totalorder %v3467_v38, 2 }
 0x202   :  { %v1684_v12 = vadd.s32 %v3402_v35, %v3413_v8  ;;  %v1700_v45 = vsub.s32 32, %v1699_v3  ;;  %v1704_v15 = vsub.s32 4294967266, %v1699_v3  ;;  %v1579_v57 = vmul.u32 %v1572_v32, %v1563_v2 }
 0x203   :  { %v1582_v31 = vadd.s32 1, %v3485_v11  ;;  %v1844_v61 = vor.u32 8388608, %v3479_v63  ;;  %v1851_v17 = vsub.s32 32, %v1850_v49  ;;  %v1701_v21 = vshll.u32 %v3463_v25, %v1699_v3 }
 0x204   :  { %v2251_v41 = vpop.eup %2250  ;;  %v1702_v26 = vshrl.u32 %v1684_v12, %v1700_v45  ;;  %v1705_v56 = vadd.s32 127, %v1704_v15  ;;  %vm1581_vm6 = vc.u32 %v3490_v47, %v3484_v30  ;;  %v1715_v35 = vsel %vm1630_vm14, %v1714_v60, %v3447_v42  ;;  %v288_v12 = vpop.permute.xlu1 %287 }
 0x205   :  { %v2253_v37 = vpop.eup %2252  ;;  %v1416_v36 = vxor.u32 2147483648, %v2251_v41  ;;  %v1583_v8 = vsel %vm1581_vm6, %v1582_v31, %v3485_v11  ;;  %v3507_v39 = vshrl.u32 %v1848_v1, 5  ;;  %v1853_v4 = vshll.u32 %v2281_v44, %v1850_v49 }
 0x206   :  { %v1413_v28 = vxor.u32 2147483648, %v2253_v37  ;;  %v1703_v9 = vor.u32 %v1702_v26, %v1701_v21  ;;  %v1706_v16 = vshll.u32 %v1705_v56, 23  ;;  %v1584_v5 = vadd.s32 %v1583_v8, %v1579_v57 }
 0x207   :  { %v1417_v25 = vsel %vm1415_vm5, %v1416_v36, %v2253_v37  ;;  %v1854_v34 = vshrl.u32 %v2282_v48, %v1851_v17  ;;  %v1857_v6 = vshrl.u32 %v2283_v22, %v1851_v17  ;;  %v1856_v32 = vshll.u32 %v2282_v48, %v1850_v49 }
 0x208   :  { %v1414_v42 = vsel %vm1412_vm4, %v2251_v41, %v1413_v28  ;;  %v1707_v10 = vor.u32 4788187, %v1706_v16  ;;  %v1585_v55 = vadd.s32 536870912, %v1584_v5  ;;  %v1710_v19 = vcvt.s32.f32 %v1703_v9 }
 0x209   :  { %v1418_v63 = vsel %vm1411_vm1, %v1414_v42, %v1417_v25  ;;  %v1860_v58 = vshrl.u32 %v2284_v51, %v1851_v17  ;;  %v1862_v7 = vshll.u32 %v2284_v51, %v1850_v49  ;;  %v1863_v13 = vshrl.u32 %v2285_v53, %v1851_v17  ;;  %v296_v42 = vpop.permute.xlu1 %295 }
 0x20a   :  { %v1419_v20 = vsel %vm1408_vm3, nan, %v1418_v63  ;;  %v1708_v2 = vand.u32 2147483647, %v1707_v10  ;;  %v3523_v14 = vshrl.u32 %v1585_v55, 30  ;;  %v1855_v38 = vor.u32 %v1854_v34, %v1853_v4 }
 0x20b   :  { %2054 = vst.msk [vmem:[%s3779_s4 + $0x48] sm:$0xff] %vm2044_vm12, %v1419_v20  ;;  %v1858_v27 = vor.u32 %v1857_v6, %v1856_v32  ;;  %v1859_v11 = vshll.u32 %v2283_v22, %v1850_v49  ;;  %v1866_v52 = vshrl.u32 %v2286_v62, %v1851_v17  ;;  %vm3534_vm7 = vcmp.le.f32.partialorder %v1628_v0, 0.7853982 }
 0x20c   :  { %v1711_v1 = vmul.f32 %v1710_v19, %v1708_v2  ;;  %v1587_v3 = vshll.u32 %v3523_v14, 30  ;;  %v1864_v60 = vor.u32 %v1863_v13, %v1862_v7  ;;  %v1717_v45 = vsel %vm3534_vm7, 0, %v1715_v35 }
 0x20d   :  { %v1861_v15 = vor.u32 %v1860_v58, %v1859_v11  ;;  %v1865_v57 = vshll.u32 %v2285_v53, %v1850_v49  ;;  %v1884_v31 = vshll.u32 %v1844_v61, 8  ;;  %vm1868_vm8 = vcmp.lt.s32.totalorder %v3507_v39, 1 }
 0x20e   :  { %v1712_v41 = vxor.u32 2147483648, %v1711_v1  ;;  %v1588_v21 = vsub.s32 %v1584_v5, %v1587_v3  ;;  %vm1871_vm10 = vcmp.lt.s32.totalorder %v3507_v39, 4  ;;  %v1876_v26 = vsel %vm1868_vm8, %v1855_v38, %v1858_v27 }
 0x20f   :  { %v1867_v0 = vor.u32 %v1866_v52, %v1865_v57  ;;  %v1877_v56 = vsel %vm1871_vm10, %v1864_v60, 920167782  ;;  %v315_v37 = vmul.f32 %v2416_v40, %v288_v12  ;;  %v1852_v61 = vshrl.u32 %v2281_v44, %v1851_v17 }
 0x210   :  { %v1713_v36 = vsel %vm1630_vm14, %v1712_v41, %v1711_v1  ;;  %v1590_v49 = vsub.s32 0, %v1588_v21  ;;  %vm1870_vm11 = vcmp.lt.s32.totalorder %v3507_v39, 3  ;;  %vm1869_vm9 = vcmp.lt.s32.totalorder %v3507_v39, 2 }
 0x211   :  { %v1716_v35 = vsel %vm3534_vm7, %v3304_v23, %v1713_v36  ;;  %v1873_v8 = vsel %vm1871_vm10, %v1861_v15, 2102212464  ;;  %v1878_v28 = vsel %vm1870_vm11, %v1861_v15, %v1877_v56  ;;  %v1880_v17 = vsel %vm1868_vm8, %v1858_v27, %v1861_v15 }
 0x212   :  { %2254 = vcosq.f32 %v1716_v35  ;;  %v2112_v9 = vmin.u32 %v1590_v49, %v1588_v21  ;;  %v1879_v16 = vsel %vm1869_vm9, %v1876_v26, %v1878_v28  ;;  %v1881_v5 = vsel %vm1871_vm10, %v1867_v0, 1326507024 }
 0x213   :  { %2256 = vsinq.f32 %v1716_v35  ;;  %v3567_v25 = vmul.u32.u64.low %v1884_v31, %v1879_v16  ;;  %v3568_v4 = vmul.u32.u64.high %v1884_v31, %v1879_v16, %v3567_v25  ;;  %v1721_v34 = vadd.s32 3, %v1717_v45 }
 0x214   :  { %v1592_v6 = vclz %v2112_v9  ;;  %v1872_v10 = vsel %vm1868_vm8, %v1852_v61, %v1855_v38  ;;  %v1874_v55 = vsel %vm1870_vm11, %v1858_v27, %v1873_v8  ;;  %v1882_v32 = vsel %vm1870_vm11, %v1864_v60, %v1881_v5 }
 0x215   :  { %v331_v63 = vadd.f32 %v315_v37, %v2413_v33  ;;  %v1610_v58 = vsub.s32 4, %v3523_v14  ;;  %v1883_v7 = vsel %vm1869_vm9, %v1880_v17, %v1882_v32  ;;  %v317_v38 = vmul.f32 %v2416_v40, %v296_v42 }
 0x216   :  { %v2113_v19 = vadd.s32 4294967294, %v1592_v6  ;;  %v3581_v20 = vmul.u32.u64.low %v1884_v31, %v1883_v7  ;;  %v3582_v2 = vmul.u32.u64.high %v1884_v31, %v1883_v7, %v3581_v20  ;;  %v1875_v27 = vsel %vm1869_vm9, %v1872_v10, %v1874_v55 }
 0x217   :  { %v354_v13 = vmul.f32 %v3265_v18, %v331_v63  ;;  %v1894_v11 = vadd.s32 1, %v3568_v4  ;;  %v1722_v33 = vand.u32 3, %v1721_v34  ;;  %vm1526_vm14 = vcmp.lt.s32.totalorder %v3360_v29, 0 }
 0x218   :  { %vm2114_vm13 = vcmp.lt.s32.totalorder %v2113_v19, 0  ;;  %v1580_v1 = vadd.s32 %v3484_v30, %v3490_v47  ;;  %v1611_v40 = vsel %vm1526_vm14, %v1610_v58, %v3523_v14  ;;  %v1891_v12 = vmul.u32 %v1884_v31, %v1875_v27 }
 0x219   :  { %v1595_v52 = vsel %vm2114_vm13, 0, %v2113_v19  ;;  %v3591_v50 = vadd.f32 %v3301_v54, %v354_v13  ;;  %vm1893_vm15 = vc.u32 %v3582_v2, %v3567_v25  ;;  %v333_v45 = vadd.f32 %v317_v38, %v2422_v43 }
 0x21a   :  { %v1596_v3 = vsub.s32 32, %v1595_v52  ;;  %v1600_v60 = vsub.s32 4294967266, %v1595_v52  ;;  %v1597_v39 = vshll.u32 %v1588_v21, %v1595_v52  ;;  %v1895_v41 = vsel %vm1893_vm15, %v1894_v11, %v3568_v4 }
 0x21b   :  { %v1735_v0 = vand.u32 2139095040, %v3591_v50  ;;  %v1896_v30 = vadd.s32 %v1895_v41, %v1891_v12  ;;  %v1732_v47 = vand.u32 2147483647, %v3591_v50  ;;  %vm3606_vm0 = vcmp.le.f32.partialorder %v1524_v24, 0.7853982 }
 0x21c   :  { %v1598_v15 = vshrl.u32 %v1580_v1, %v1596_v3  ;;  %v1601_v57 = vadd.s32 127, %v1600_v60  ;;  %vm1720_vm1 = vweird.f32 %v3304_v23  ;;  %vm1724_vm2 = vcmp.eq.s32.totalorder %v1722_v33, 0 }
 0x21d   :  { %v1736_v26 = vshrl.u32 %v1735_v0, 23  ;;  %v1613_v43 = vsel %vm3606_vm0, 0, %v1611_v40  ;;  %v1897_v37 = vadd.s32 536870912, %v1896_v30  ;;  %v356_v24 = vmul.f32 %v3265_v18, %v333_v45 }
 0x21e   :  { %v1599_v31 = vor.u32 %v1598_v15, %v1597_v39  ;;  %v1602_v21 = vshll.u32 %v1601_v57, 23  ;;  %vm1727_vm3 = vcmp.eq.s32.totalorder %v1722_v33, 2  ;;  %v1739_v9 = vand.u32 8388607, %v1732_v47 }
 0x21f   :  { %v2255_v56 = vpop.eup %2254  ;;  %v2119_v35 = vadd.s32 4294967169, %v1736_v26  ;;  %v3614_v28 = vshrl.u32 %v1897_v37, 30  ;;  %vm1723_vm4 = vcmp.lt.s32.totalorder %v1722_v33, 2  ;;  %v1617_v6 = vadd.s32 3, %v1613_v43 }
 0x220   :  { %v2257_v36 = vpop.eup %2256  ;;  %v1728_v49 = vxor.u32 2147483648, %v2255_v56  ;;  %v1603_v61 = vor.u32 4788187, %v1602_v21  ;;  %v1606_v5 = vcvt.s32.f32 %v1599_v31  ;;  %v3621_v18 = vadd.f32 %v3301_v54, %v356_v24 }
 0x221   :  { %v1725_v8 = vxor.u32 2147483648, %v2257_v36  ;;  %v1742_v4 = vadd.s32 1, %v2119_v35  ;;  %v1899_v42 = vshll.u32 %v3614_v28, 30  ;;  %v1740_v19 = vor.u32 8388608, %v1739_v9 }
 0x222   :  { %v1729_v16 = vsel %vm1727_vm3, %v1728_v49, %v2257_v36  ;;  %v1604_v17 = vand.u32 2147483647, %v1603_v61  ;;  %v3634_v38 = vand.u32 3, %v1617_v6  ;;  %v1943_v27 = vand.u32 2139095040, %v3621_v18 }
 0x223   :  { %v1726_v34 = vsel %vm1724_vm2, %v2255_v56, %v1725_v8  ;;  %vm1743_vm5 = vcmp.gt.s32.totalorder %v1742_v4, 0  ;;  %v3625_v63 = vsub.s32 %v1896_v30, %v1899_v42  ;;  %v1892_v33 = vadd.s32 %v3567_v25, %v3582_v2 }
 0x224   :  { %v1730_v10 = vsel %vm1723_vm4, %v1726_v34, %v1729_v16  ;;  %v1607_v55 = vmul.f32 %v1606_v5, %v1604_v17  ;;  %v1744_v58 = vsel %vm1743_vm5, %v1742_v4, 0  ;;  %v3643_v1 = vshll.u32 %v1740_v19, 8 }
 0x225   :  { %v1731_v32 = vsel %vm1720_vm1, nan, %v1730_v10  ;;  %v1746_v20 = vand.u32 31, %v1744_v58  ;;  %v1902_v13 = vsub.s32 0, %v3625_v63  ;;  %v1922_v3 = vsub.s32 4, %v3614_v28 }
 0x226   :  { %2057 = vst.msk [vmem:[%s3779_s4 + $0x60] sm:$0xff] %vm2044_vm12, %v1731_v32  ;;  %v1608_v7 = vxor.u32 2147483648, %v1607_v55  ;;  %v1745_v12 = vshrl.u32 %v1744_v58, 5  ;;  %v1944_v57 = vshrl.u32 %v1943_v27, 23  ;;  %vm1838_vm6 = vcmp.lt.s32.totalorder %v3423_v46, 0 }
 0x227   :  { %v1747_v23 = vsub.s32 32, %v1746_v20  ;;  %v2124_v52 = vmin.u32 %v1902_v13, %v3625_v63  ;;  %v1749_v45 = vshll.u32 %v2281_v44, %v1746_v20  ;;  %v1752_v15 = vshll.u32 %v2282_v48, %v1746_v20 }
 0x228   :  { %v1609_v54 = vsel %vm1526_vm14, %v1608_v7, %v1607_v55  ;;  %v1755_v25 = vshll.u32 %v2283_v22, %v1746_v20  ;;  %v1758_v30 = vshll.u32 %v2284_v51, %v1746_v20  ;;  %v1761_v26 = vshll.u32 %v2285_v53, %v1746_v20 }
 0x229   :  { %v1612_v11 = vsel %vm3606_vm0, %v3360_v29, %v1609_v54  ;;  %v1750_v60 = vshrl.u32 %v2282_v48, %v1747_v23  ;;  %v1753_v40 = vshrl.u32 %v2283_v22, %v1747_v23  ;;  %v1904_v39 = vclz %v2124_v52 }
 0x22a   :  { %2258 = vcosq.f32 %v1612_v11  ;;  %v1756_v2 = vshrl.u32 %v2284_v51, %v1747_v23  ;;  %v1759_v14 = vshrl.u32 %v2285_v53, %v1747_v23  ;;  %v1762_v56 = vshrl.u32 %v2286_v62, %v1747_v23 }
 0x22b   :  { %2260 = vsinq.f32 %v1612_v11  ;;  %v2125_v41 = vadd.s32 4294967294, %v1904_v39  ;;  %v1751_v0 = vor.u32 %v1750_v60, %v1749_v45  ;;  %v1754_v31 = vor.u32 %v1753_v40, %v1752_v15 }
 0x22c   :  { %v1757_v21 = vor.u32 %v1756_v2, %v1755_v25  ;;  %v1748_v43 = vshrl.u32 %v2281_v44, %v1747_v23  ;;  %v1760_v37 = vor.u32 %v1759_v14, %v1758_v30  ;;  %vm1764_vm8 = vcmp.lt.s32.totalorder %v1745_v12, 1 }
 0x22d   :  { %vm2126_vm7 = vcmp.lt.s32.totalorder %v2125_v41, 0  ;;  %v1763_v49 = vor.u32 %v1762_v56, %v1761_v26  ;;  %vm1765_vm10 = vcmp.lt.s32.totalorder %v1745_v12, 2  ;;  %vm1767_vm11 = vcmp.lt.s32.totalorder %v1745_v12, 4 }
 0x22e   :  { %v1907_v36 = vsel %vm2126_vm7, 0, %v2125_v41  ;;  %vm1766_vm9 = vcmp.lt.s32.totalorder %v1745_v12, 3  ;;  %v1769_v24 = vsel %vm1767_vm11, %v1757_v21, 2102212464  ;;  %v1772_v9 = vsel %vm1764_vm8, %v1751_v0, %v1754_v31 }
 0x22f   :  { %v1908_v61 = vsub.s32 32, %v1907_v36  ;;  %v1912_v35 = vsub.s32 4294967266, %v1907_v36  ;;  %v1909_v8 = vshll.u32 %v3625_v63, %v1907_v36  ;;  %v1773_v16 = vsel %vm1767_vm11, %v1760_v37, 920167782 }
 0x230   :  { %v1776_v17 = vsel %vm1764_vm8, %v1754_v31, %v1757_v21  ;;  %vm3663_vm13 = vcmp.le.f32.partialorder %v1836_v59, 0.7853982  ;;  %v1774_v6 = vsel %vm1766_vm9, %v1757_v21, %v1773_v16  ;;  %v1777_v42 = vsel %vm1767_vm11, %v1763_v49, 1326507024 }
 0x231   :  { %v1910_v4 = vshrl.u32 %v1892_v33, %v1908_v61  ;;  %v1913_v34 = vadd.s32 127, %v1912_v35  ;;  %vm1616_vm14 = vweird.f32 %v3360_v29  ;;  %v1768_v10 = vsel %vm1764_vm8, %v1748_v43, %v1751_v0 }
 0x232   :  { %v1775_v55 = vsel %vm1765_vm10, %v1772_v9, %v1774_v6  ;;  %v1778_v32 = vsel %vm1766_vm9, %v1760_v37, %v1777_v42  ;;  %v2127_v63 = vadd.s32 4294967169, %v1944_v57  ;;  %v1770_v59 = vsel %vm1766_vm9, %v1754_v31, %v1769_v24 }
 0x233   :  { %v1911_v19 = vor.u32 %v1910_v4, %v1909_v8  ;;  %v1914_v58 = vshll.u32 %v1913_v34, 23  ;;  %v1779_v7 = vsel %vm1765_vm10, %v1776_v17, %v1778_v32  ;;  %vm1619_vm15 = vcmp.lt.s32.totalorder %v3634_v38, 2 }
 0x234   :  { %v3675_v20 = vmul.u32.u64.low %v3643_v1, %v1779_v7  ;;  %v3676_v13 = vmul.u32.u64.high %v3643_v1, %v1779_v7, %v3675_v20  ;;  %v3679_v54 = vmul.u32.u64.low %v3643_v1, %v1775_v55  ;;  %v3680_v23 = vmul.u32.u64.high %v3643_v1, %v1775_v55, %v3679_v54 }
 0x235   :  { %vm1623_vm0 = vcmp.eq.s32.totalorder %v3634_v38, 2  ;;  %v1915_v11 = vor.u32 4788187, %v1914_v58  ;;  %v1950_v33 = vadd.s32 1, %v2127_v63  ;;  %v1923_v40 = vsel %vm1838_vm6, %v1922_v3, %v3614_v28 }
 0x236   :  { %v1771_v39 = vsel %vm1765_vm10, %v1768_v10, %v1770_v59  ;;  %v1940_v45 = vand.u32 2147483647, %v3621_v18  ;;  %v1918_v2 = vcvt.s32.f32 %v1911_v19  ;;  %vm1620_vm2 = vcmp.eq.s32.totalorder %v3634_v38, 0 }
 0x237   :  { %v2259_v27 = vpop.eup %2258  ;;  %v1916_v25 = vand.u32 2147483647, %v1915_v11  ;;  %vm1951_vm1 = vcmp.gt.s32.totalorder %v1950_v33, 0  ;;  %vm1789_vm3 = vc.u32 %v3676_v13, %v3679_v54  ;;  %v1790_v41 = vadd.s32 1, %v3680_v23 }
 0x238   :  { %v2261_v52 = vpop.eup %2260  ;;  %v1624_v60 = vxor.u32 2147483648, %v2259_v27  ;;  %v1787_v28 = vmul.u32 %v3643_v1, %v1771_v39  ;;  %v1952_v3 = vsel %vm1951_vm1, %v1950_v33, 0  ;;  %v1925_v14 = vsel %vm3663_vm13, 0, %v1923_v40 }
 0x239   :  { %v1621_v15 = vxor.u32 2147483648, %v2261_v52  ;;  %v1919_v30 = vmul.f32 %v1918_v2, %v1916_v25  ;;  %v1791_v31 = vsel %vm1789_vm3, %v1790_v41, %v3680_v23  ;;  %v1954_v21 = vand.u32 31, %v1952_v3 }
 0x23a   :  { %v1625_v57 = vsel %vm1623_vm0, %v1624_v60, %v2261_v52  ;;  %v1792_v43 = vadd.s32 %v1791_v31, %v1787_v28  ;;  %v1947_v37 = vand.u32 8388607, %v1940_v45  ;;  %v1953_v38 = vshrl.u32 %v1952_v3, 5 }
 0x23b   :  { %v1622_v0 = vsel %vm1620_vm2, %v2259_v27, %v1621_v15  ;;  %v1920_v56 = vxor.u32 2147483648, %v1919_v30  ;;  %v1955_v1 = vsub.s32 32, %v1954_v21  ;;  %v1957_v36 = vshll.u32 %v2281_v44, %v1954_v21 }
 0x23c   :  { %v1626_v12 = vsel %vm1619_vm15, %v1622_v0, %v1625_v57  ;;  %v1960_v49 = vshll.u32 %v2282_v48, %v1954_v21  ;;  %v1793_v61 = vadd.s32 536870912, %v1792_v43  ;;  %v1963_v35 = vshll.u32 %v2283_v22, %v1954_v21 }
 0x23d   :  { %v1627_v26 = vsel %vm1616_vm14, nan, %v1626_v12  ;;  %v1921_v29 = vsel %vm1838_vm6, %v1920_v56, %v1919_v30  ;;  %v1966_v24 = vshll.u32 %v2284_v51, %v1954_v21  ;;  %v1958_v9 = vshrl.u32 %v2282_v48, %v1955_v1 }
 0x23e   :  { %2056 = vst.msk [vmem:[%s3779_s4 + $0x58] sm:$0xff] %vm2044_vm12, %v1627_v26  ;;  %v1924_v8 = vsel %vm3663_vm13, %v3423_v46, %v1921_v29  ;;  %v1961_v16 = vshrl.u32 %v2283_v22, %v1955_v1  ;;  %v1969_v17 = vshll.u32 %v2285_v53, %v1954_v21  ;;  %v3720_v4 = vshrl.u32 %v1793_v61, 30 }
 0x23f   :  { %2262 = vcosq.f32 %v1924_v8  ;;  %v1964_v34 = vshrl.u32 %v2284_v51, %v1955_v1  ;;  %v1967_v6 = vshrl.u32 %v2285_v53, %v1955_v1  ;;  %v1959_v42 = vor.u32 %v1958_v9, %v1957_v36 }
 0x240   :  { %2264 = vsinq.f32 %v1924_v8  ;;  %v1962_v10 = vor.u32 %v1961_v16, %v1960_v49  ;;  %v1970_v55 = vshrl.u32 %v2286_v62, %v1955_v1  ;;  %v1795_v5 = vshll.u32 %v3720_v4, 30 }
 0x241   :  { %v1948_v32 = vor.u32 8388608, %v1947_v37  ;;  %v1965_v48 = vor.u32 %v1964_v34, %v1963_v35  ;;  %v1968_v63 = vor.u32 %v1967_v6, %v1966_v24  ;;  %vm1972_vm4 = vcmp.lt.s32.totalorder %v1953_v38, 1 }
 0x242   :  { %v1971_v22 = vor.u32 %v1970_v55, %v1969_v17  ;;  %v1796_v19 = vsub.s32 %v1792_v43, %v1795_v5  ;;  %vm1975_vm5 = vcmp.lt.s32.totalorder %v1953_v38, 4  ;;  %v1929_v58 = vadd.s32 3, %v1925_v14 }
 0x243   :  { %vm1974_vm6 = vcmp.lt.s32.totalorder %v1953_v38, 3  ;;  %v1980_v51 = vsel %vm1972_vm4, %v1959_v42, %v1962_v10  ;;  %v1981_v59 = vsel %vm1975_vm5, %v1968_v63, 920167782  ;;  %vm1973_vm7 = vcmp.lt.s32.totalorder %v1953_v38, 2 }
 0x244   :  { %v1798_v53 = vsub.s32 0, %v1796_v19  ;;  %v1982_v7 = vsel %vm1974_vm6, %v1965_v48, %v1981_v59  ;;  %v1988_v20 = vshll.u32 %v1948_v32, 8  ;;  %v1977_v62 = vsel %vm1975_vm5, %v1965_v48, 2102212464 }
 0x245   :  { %v1983_v23 = vsel %vm1973_vm7, %v1980_v51, %v1982_v7  ;;  %v1984_v27 = vsel %vm1972_vm4, %v1962_v10, %v1965_v48  ;;  %v1985_v11 = vsel %vm1975_vm5, %v1971_v22, 1326507024  ;;  %v1956_v52 = vshrl.u32 %v2281_v44, %v1955_v1 }
 0x246   :  { %v2120_v33 = vmin.u32 %v1798_v53, %v1796_v19  ;;  %v1986_v60 = vsel %vm1974_vm6, %v1968_v63, %v1985_v11  ;;  %v3733_v39 = vmul.u32.u64.low %v1988_v20, %v1983_v23  ;;  %v3734_v15 = vmul.u32.u64.high %v1988_v20, %v1983_v23, %v3733_v39 }
 0x247   :  { %v1987_v40 = vsel %vm1973_vm7, %v1984_v27, %v1986_v60  ;;  %v1930_v25 = vand.u32 3, %v1929_v58  ;;  %v1976_v57 = vsel %vm1972_vm4, %v1956_v52, %v1959_v42  ;;  %v1978_v41 = vsel %vm1974_vm6, %v1962_v10, %v1977_v62 }
 0x248   :  { %v1800_v2 = vclz %v2120_v33  ;;  %v3738_v0 = vmul.u32.u64.low %v1988_v20, %v1987_v40  ;;  %v3739_v30 = vmul.u32.u64.high %v1988_v20, %v1987_v40, %v3738_v0  ;;  %vm1928_vm8 = vweird.f32 %v3423_v46 }
 0x249   :  { %v1979_v44 = vsel %vm1973_vm7, %v1976_v57, %v1978_v41  ;;  %v1998_v12 = vadd.s32 1, %v3734_v15  ;;  %vm1932_vm10 = vcmp.eq.s32.totalorder %v1930_v25, 0  ;;  %vm1935_vm11 = vcmp.eq.s32.totalorder %v1930_v25, 2 }
 0x24a   :  { %v2121_v28 = vadd.s32 4294967294, %v1800_v2  ;;  %v1788_v26 = vadd.s32 %v3679_v54, %v3676_v13  ;;  %vm1997_vm13 = vc.u32 %v3739_v30, %v3733_v39  ;;  %v1995_v36 = vmul.u32 %v1988_v20, %v1979_v44 }
 0x24b   :  { %vm1931_vm14 = vcmp.lt.s32.totalorder %v1930_v25, 2  ;;  %v1999_v29 = vsel %vm1997_vm13, %v1998_v12, %v3734_v15  ;;  %vm1734_vm15 = vcmp.lt.s32.totalorder %v3591_v50, 0  ;;  %v1818_v46 = vsub.s32 4, %v3720_v4 }
 0x24c   :  { %v2263_v3 = vpop.eup %2262  ;;  %vm2122_vm9 = vcmp.lt.s32.totalorder %v2121_v28, 0  ;;  %v2000_v8 = vadd.s32 %v1999_v29, %v1995_v36  ;;  %vm1733_vm0 = vcmp.le.f32.partialorder %v1732_v47, 0.7853982  ;;  %v1996_v20 = vadd.s32 %v3733_v39, %v3739_v30 }
 0x24d   :  { %v2265_v14 = vpop.eup %2264  ;;  %v1936_v31 = vxor.u32 2147483648, %v2263_v3  ;;  %v1803_v56 = vsel %vm2122_vm9, 0, %v2121_v28  ;;  %v1819_v51 = vsel %vm1734_vm15, %v1818_v46, %v3720_v4  ;;  %vm1824_vm5 = vweird.f32 %v3591_v50 }
 0x24e   :  { %v1933_v21 = vxor.u32 2147483648, %v2265_v14  ;;  %v1804_v37 = vsub.s32 32, %v1803_v56  ;;  %v1808_v1 = vsub.s32 4294967266, %v1803_v56  ;;  %v1805_v49 = vshll.u32 %v1796_v19, %v1803_v56 }
 0x24f   :  { %v1937_v43 = vsel %vm1935_vm11, %v1936_v31, %v2265_v14  ;;  %v2001_v16 = vadd.s32 536870912, %v2000_v8  ;;  %v1821_v53 = vsel %vm1733_vm0, 0, %v1819_v51  ;;  %vm1942_vm6 = vcmp.lt.s32.totalorder %v3621_v18, 0 }
 0x250   :  { %v1934_v38 = vsel %vm1932_vm10, %v2263_v3, %v1933_v21  ;;  %v1806_v35 = vshrl.u32 %v1788_v26, %v1804_v37  ;;  %v1809_v24 = vadd.s32 127, %v1808_v1  ;;  %v1825_v27 = vadd.s32 3, %v1821_v53 }
 0x251   :  { %v1938_v61 = vsel %vm1931_vm14, %v1934_v38, %v1937_v43  ;;  %v2002_v34 = vshrl.u32 %v2001_v16, 30  ;;  %vm1941_vm7 = vcmp.le.f32.partialorder %v1940_v45, 0.7853982  ;;  %vm2032_vm9 = vweird.f32 %v3621_v18 }
 0x252   :  { %v1939_v9 = vsel %vm1928_vm8, nan, %v1938_v61  ;;  %v1807_v13 = vor.u32 %v1806_v35, %v1805_v49  ;;  %v1810_v54 = vshll.u32 %v1809_v24, 23  ;;  %v1826_v40 = vand.u32 3, %v1825_v27 }
 0x253   :  { %2059 = vst.msk [vmem:[%s3779_s4 + $0x70] sm:$0xff] %vm2044_vm12, %v1939_v9  ;;  %v2003_v10 = vshll.u32 %v2002_v34, 30  ;;  %v2026_v14 = vsub.s32 4, %v2002_v34 }
 0x254   :  { %v1811_v17 = vor.u32 4788187, %v1810_v54  ;;  %v1814_v42 = vcvt.s32.f32 %v1807_v13  ;;  %vm1831_vm2 = vcmp.eq.s32.totalorder %v1826_v40, 2  ;;  %vm1828_vm3 = vcmp.eq.s32.totalorder %v1826_v40, 0 }
 0x255   :  { %v2004_v5 = vsub.s32 %v2000_v8, %v2003_v10  ;;  %vm1827_vm4 = vcmp.lt.s32.totalorder %v1826_v40, 2  ;;  %v2027_v26 = vsel %vm1942_vm6, %v2026_v14, %v2002_v34 }
 0x256   :  { %v1812_v6 = vand.u32 2147483647, %v1811_v17 }
 0x257   :  { %v2006_v48 = vsub.s32 0, %v2004_v5 }
 0x258   :  { %v1815_v55 = vmul.f32 %v1814_v42, %v1812_v6 }
 0x259   :  { %v2128_v22 = vmin.u32 %v2006_v48, %v2004_v5 }
 0x25a   :  { %v1816_v32 = vxor.u32 2147483648, %v1815_v55 }
 0x25b   :  { %v2008_v58 = vclz %v2128_v22 }
 0x25c   :  { %v1817_v63 = vsel %vm1734_vm15, %v1816_v32, %v1815_v55 }
 0x25d   :  { %v1820_v19 = vsel %vm1733_vm0, %v3591_v50, %v1817_v63  ;;  %v2129_v59 = vadd.s32 4294967294, %v2008_v58  ;;  %v2029_v50 = vsel %vm1941_vm7, 0, %v2027_v26 }
 0x25e   :  { %2266 = vcosq.f32 %v1820_v19  ;;  %v2033_v56 = vadd.s32 3, %v2029_v50 }
 0x25f   :  { %2268 = vsinq.f32 %v1820_v19  ;;  %vm2130_vm1 = vcmp.lt.s32.totalorder %v2129_v59, 0 }
 0x260   :  { %v2011_v7 = vsel %vm2130_vm1, 0, %v2129_v59  ;;  %v2034_v43 = vand.u32 3, %v2033_v56 }
 0x261   :  { %v2012_v62 = vsub.s32 32, %v2011_v7  ;;  %v2016_v23 = vsub.s32 4294967266, %v2011_v7  ;;  %v2013_v11 = vshll.u32 %v2004_v5, %v2011_v7 }
 0x262   :  { %vm2039_vm8 = vcmp.eq.s32.totalorder %v2034_v43, 2  ;;  %vm2036_vm10 = vcmp.eq.s32.totalorder %v2034_v43, 0  ;;  %vm2035_vm11 = vcmp.lt.s32.totalorder %v2034_v43, 2 }
 0x263   :  { %v2014_v47 = vshrl.u32 %v1996_v20, %v2012_v62  ;;  %v2017_v33 = vadd.s32 127, %v2016_v23 }
 0x265   :  { %v2015_v52 = vor.u32 %v2014_v47, %v2013_v11  ;;  %v2018_v60 = vshll.u32 %v2017_v33, 23 }
 0x267   :  { %v2019_v15 = vor.u32 4788187, %v2018_v60  ;;  %v2022_v41 = vcvt.s32.f32 %v2015_v52 }
 0x269   :  { %v2020_v57 = vand.u32 2147483647, %v2019_v15 }
 0x26b   :  { %v2267_v25 = vpop.eup %2266  ;;  %v2023_v39 = vmul.f32 %v2022_v41, %v2020_v57 }
 0x26c   :  { %v2269_v2 = vpop.eup %2268  ;;  %v1832_v4 = vxor.u32 2147483648, %v2267_v25 }
 0x26d   :  { %v1829_v0 = vxor.u32 2147483648, %v2269_v2  ;;  %v2024_v44 = vxor.u32 2147483648, %v2023_v39 }
 0x26e   :  { %v1833_v28 = vsel %vm1831_vm2, %v1832_v4, %v2269_v2 }
 0x26f   :  { %v1830_v30 = vsel %vm1828_vm3, %v2267_v25, %v1829_v0  ;;  %v2025_v31 = vsel %vm1942_vm6, %v2024_v44, %v2023_v39 }
 0x270   :  { %v1834_v3 = vsel %vm1827_vm4, %v1830_v30, %v1833_v28  ;;  %v2028_v21 = vsel %vm1941_vm7, %v3621_v18, %v2025_v31 }
 0x271   :  { %v1835_v12 = vsel %vm1824_vm5, nan, %v1834_v3  ;;  %2270 = vcosq.f32 %v2028_v21 }
 0x272   :  { %2058 = vst.msk [vmem:[%s3779_s4 + $0x68] sm:$0xff] %vm2044_vm12, %v1835_v12  ;;  %2272 = vsinq.f32 %v2028_v21 }
 0x27e   :  { %v2271_v37 = vpop.eup %2270 }
 0x27f   :  { %v2273_v1 = vpop.eup %2272  ;;  %v2040_v36 = vxor.u32 2147483648, %v2271_v37 }
 0x280   :  { %v2037_v38 = vxor.u32 2147483648, %v2273_v1 }
 0x281   :  { %v2041_v49 = vsel %vm2039_vm8, %v2040_v36, %v2273_v1 }
 0x282   :  { %v2038_v29 = vsel %vm2036_vm10, %v2271_v37, %v2037_v38 }
 0x283   :  { %v2042_v45 = vsel %vm2035_vm11, %v2038_v29, %v2041_v49 }
 0x284   :  { %v2043_v61 = vsel %vm2032_vm9, nan, %v2042_v45 }
 0x285   :  { %2060 = vst.msk [vmem:[%s3779_s4 + $0x78] sm:$0xff] %vm2044_vm12, %v2043_v61 }

</bundles_post_ra>
